<compile_context>
chip_gen: v7x
topology: tpu7x:2x2x1
jax: 0.10.0
libtpu: 0.0.40
codegen_flags: <defaults>
</compile_context>

<pallas_src>
import jax
import jax.numpy as jnp
from jax.experimental import pallas as pl
from jax.experimental.pallas import tpu as pltpu

C_PAD = 128  # lane-dense channel padding for every matmul operand / output block


# ----------------------------- fused Pallas kernel -----------------------------

def _make_cnn_kernel(K, pad, l1, l2, l3):
    """Builds the fused kernel; one grid step == one batch element."""

    def kernel(xe_ref, xo_ref,
               w1_ref, s1_ref, w2_ref, s2_ref, w3_ref, s3_ref,
               wh_ref, bh_ref,
               logits_ref, emb_ref,
               a1_ref, a2_ref):
        # Zero the padded-activation scratch buffers; their border rows are the conv
        # zero-padding for layers 2/3 (re-zeroed each grid step since scratch persists).
        a1_ref[...] = jnp.zeros_like(a1_ref)
        a2_ref[...] = jnp.zeros_like(a2_ref)

        xe = xe_ref[0]  # (Lhalf, C_PAD) f32 : even rows of zero-padded channels-last input
        xo = xo_ref[0]  # (Lhalf, C_PAD) f32 : odd rows

        # ---- Layer 1: Conv1d(stride=2, pad=K//2) + BN + ReLU (BN scale folded in W) ----
        acc = jnp.zeros((l1, C_PAD), jnp.float32)
        for k in range(K):
            m = k // 2
            xk = xe[m:m + l1, :] if k % 2 == 0 else xo[m:m + l1, :]
            acc = acc + jnp.dot(xk.astype(jnp.bfloat16), w1_ref[k],
                                preferred_element_type=jnp.float32)
        a1 = jnp.maximum(acc + s1_ref[...], 0.0)
        a1_ref[pad:pad + l1, :] = a1                       # real rows of padded activation 1

        # ---- Layer 2: Conv1d(stride=1, pad=K//2) + BN + ReLU ----
        acc = jnp.zeros((l2, C_PAD), jnp.float32)
        for k in range(K):
            acc = acc + jnp.dot(a1_ref[k:k + l2, :].astype(jnp.bfloat16), w2_ref[k],
                                preferred_element_type=jnp.float32)
        a2 = jnp.maximum(acc + s2_ref[...], 0.0)
        a2_ref[pad:pad + l2, :] = a2                       # real rows of padded activation 2

        # ---- Layer 3: Conv1d(stride=1, pad=K//2) + BN + ReLU ----
        acc = jnp.zeros((l3, C_PAD), jnp.float32)
        for k in range(K):
            acc = acc + jnp.dot(a2_ref[k:k + l3, :].astype(jnp.bfloat16), w3_ref[k],
                                preferred_element_type=jnp.float32)
        a3 = jnp.maximum(acc + s3_ref[...], 0.0)           # (l3, C_PAD) f32

        # ---- Global max pool over length + Linear head (fused, VMEM-resident) ----
        emb = jnp.max(a3, axis=0, keepdims=True)           # (1, C_PAD)
        emb_ref[0] = emb
        logits = jnp.dot(emb.astype(jnp.bfloat16), wh_ref[...],
                         preferred_element_type=jnp.float32) + bh_ref[...]
        logits_ref[0] = logits

    return kernel


# ----------------------------- JAX wrapper -----------------------------

def _fold_bn_into_weight(layer, eps):
    w = layer["w"]                                         # (Cout, Cin, K)
    c_out, c_in, _ = w.shape
    scale = layer["gamma"] / jnp.sqrt(layer["var"] + eps)
    shift = layer["beta"] - layer["mean"] * scale
    w_eff = jnp.transpose(w, (2, 1, 0)) * scale[None, None, :]          # (K, Cin, Cout)
    w_eff = jnp.pad(w_eff, ((0, 0), (0, C_PAD - c_in), (0, C_PAD - c_out)))
    shift_p = jnp.pad(shift, (0, C_PAD - c_out)).reshape(1, C_PAD)
    return w_eff.astype(jnp.bfloat16), shift_p.astype(jnp.float32)


def cnn_forward(x, params, w_head, b_head,
                kernel_size=(8, 8, 8), stride=(2, 1, 1), eps=1e-5):
    """x: (B, in_ch, L) f32.  Returns (logits (B, num_classes), emb (B, out_ch))."""
    B, c_in, L = x.shape
    K = kernel_size[0]
    pad = K // 2
    assert all(k == K for k in kernel_size) and tuple(stride) == (2, 1, 1), \
        "kernel specialized to the module defaults (K=8, stride=[2,1,1])"

    # PyTorch Conv1d output lengths of the three layers.
    l1 = (L + 2 * pad - K) // 2 + 1
    l2 = (l1 + 2 * pad - K) + 1
    l3 = (l2 + 2 * pad - K) + 1

    # ---- Input prep (tiny, done once): NCL -> channels-last, conv zero padding,
    #      pad channels to 128 lanes, even/odd row split for the stride-2 first layer. ----
    x_cl = jnp.transpose(x, (0, 2, 1))                                  # (B, L, Cin)
    lp = L + 2 * pad
    lpp = lp + (lp % 2)                                                 # even total length
    x_cl = jnp.pad(x_cl, ((0, 0), (pad, lpp - L - pad), (0, C_PAD - c_in)))
    xe = x_cl[:, 0::2, :]                                               # (B, lpp//2, C_PAD)
    xo = x_cl[:, 1::2, :]
    lhalf = lpp // 2
    assert l1 + (K - 1) // 2 <= lhalf

    # ---- Fold BN into weights, pad all channel dims to 128 lanes, bf16 for the MXU. ----
    w1, s1 = _fold_bn_into_weight(params[0], eps)
    w2, s2 = _fold_bn_into_weight(params[1], eps)
    w3, s3 = _fold_bn_into_weight(params[2], eps)
    nc, c_emb = w_head.shape
    wh = jnp.pad(jnp.transpose(w_head),
                 ((0, C_PAD - c_emb), (0, C_PAD - nc))).astype(jnp.bfloat16)
    bh = jnp.pad(b_head, (0, C_PAD - nc)).reshape(1, C_PAD).astype(jnp.float32)

    r1 = -(-(l1 + 2 * pad) // 8) * 8      # padded-activation scratch rows (sublane multiple)
    r2 = -(-(l2 + 2 * pad) // 8) * 8

    kernel = _make_cnn_kernel(K, pad, l1, l2, l3)

    full2 = lambda b: (0, 0)
    full3 = lambda b: (0, 0, 0)
    per_b = lambda b: (b, 0, 0)

    logits_p, emb_p = pl.pallas_call(
        kernel,
        out_shape=(
            jax.ShapeDtypeStruct((B, 1, C_PAD), jnp.float32),   # logits (lane-dense, sliced below)
            jax.ShapeDtypeStruct((B, 1, C_PAD), jnp.float32),   # embedding
        ),
        grid_spec=pltpu.PrefetchScalarGridSpec(
            num_scalar_prefetch=0,
            grid=(B,),
            in_specs=[
                pl.BlockSpec((1, lhalf, C_PAD), per_b),         # even rows of padded input
                pl.BlockSpec((1, lhalf, C_PAD), per_b),         # odd rows of padded input
                pl.BlockSpec((K, C_PAD, C_PAD), full3),         # layer-1 weights (BN folded)
                pl.BlockSpec((1, C_PAD), full2),                # layer-1 shift
                pl.BlockSpec((K, C_PAD, C_PAD), full3),         # layer-2 weights
                pl.BlockSpec((1, C_PAD), full2),                # layer-2 shift
                pl.BlockSpec((K, C_PAD, C_PAD), full3),         # layer-3 weights
                pl.BlockSpec((1, C_PAD), full2),                # layer-3 shift
                pl.BlockSpec((C_PAD, C_PAD), full2),            # head weight
                pl.BlockSpec((1, C_PAD), full2),                # head bias
            ],
            out_specs=(
                pl.BlockSpec((1, 1, C_PAD), per_b),
                pl.BlockSpec((1, 1, C_PAD), per_b),
            ),
            scratch_shapes=[
                pltpu.VMEM((r1, C_PAD), jnp.float32),           # padded layer-1 activation
                pltpu.VMEM((r2, C_PAD), jnp.float32),           # padded layer-2 activation
            ],
        ),
        compiler_params=pltpu.CompilerParams(
            dimension_semantics=("parallel",),
        ),
    )(xe, xo, w1, s1, w2, s2, w3, s3, wh, bh)

    return logits_p[:, 0, :nc], emb_p[:, 0, :c_emb]


# ----------------------------- params / reference -----------------------------

def init_params(key, in_ch=5, kernel_size=(8, 8, 8), feat_dim=(32, 64, 64), num_classes=3):
    params = []
    c_in = in_ch
    for k, c_out in zip(kernel_size, feat_dim):
        key, k1 = jax.random.split(key)
        w = jax.random.normal(k1, (c_out, c_in, k), jnp.float32) / jnp.sqrt(c_in * k)
        params.append(dict(
            w=w,                                      # Conv1d weight (Cout, Cin, K), bias=False
            gamma=jnp.ones((c_out,), jnp.float32),    # BatchNorm1d affine / running stats
            beta=jnp.zeros((c_out,), jnp.float32),
            mean=jnp.zeros((c_out,), jnp.float32),
            var=jnp.ones((c_out,), jnp.float32),
        ))
        c_in = c_out
    key, k1, k2 = jax.random.split(key, 3)
    w_head = jax.random.normal(k1, (num_classes, c_in), jnp.float32) / jnp.sqrt(c_in)
    b_head = jax.random.normal(k2, (num_classes,), jnp.float32) * 0.01
    return params, w_head, b_head


def cnn_reference(x, params, w_head, b_head, stride=(2, 1, 1), eps=1e-5):
    """Plain-JAX (XLA) reference of the PyTorch forward pass, for validation."""
    cur = x
    for layer, s in zip(params, stride):
        w = layer["w"]
        k = w.shape[2]
        cur = jax.lax.conv_general_dilated(
            cur, w, window_strides=(s,), padding=[(k // 2, k // 2)],
            dimension_numbers=("NCH", "OIH", "NCH"))
        scale = layer["gamma"] / jnp.sqrt(layer["var"] + eps)
        shift = layer["beta"] - layer["mean"] * scale
        cur = jnp.maximum(cur * scale[None, :, None] + shift[None, :, None], 0.0)
    emb = jnp.max(cur, axis=2)
    logits = emb @ w_head.T + b_head
    return logits, emb


# ----------------------------- main -----------------------------

if __name__ == "__main__":
    key = jax.random.PRNGKey(0)
    kp, kx = jax.random.split(key)
    params, w_head, b_head = init_params(kp)

    # Shapes consistent with the module defaults: B=2, in_ch=5, L=max_len=31.
    x = jax.random.normal(kx, (2, 5, 31), jnp.float32)

    fwd = jax.jit(lambda xx: cnn_forward(xx, params, w_head, b_head))
    logits, emb = fwd(x)
    jax.block_until_ready((logits, emb))

    assert logits.shape == (2, 3), logits.shape
    assert emb.shape == (2, 64), emb.shape
    assert bool(jnp.all(jnp.isfinite(logits))) and bool(jnp.all(jnp.isfinite(emb)))

    # Loose correctness check vs. plain-JAX reference (kernel uses bf16 MXU inputs).
    ref_logits, ref_emb = jax.jit(lambda xx: cnn_reference(xx, params, w_head, b_head))(x)
    assert float(jnp.max(jnp.abs(logits - ref_logits))) < 0.15
    assert float(jnp.max(jnp.abs(emb - ref_emb))) < 0.15

    print("KERNEL_OK")
</pallas_src>

<mosaic_0001>
module attributes {stable_mosaic.version = 11 : i64} {
  func.func @kernel(%arg0: i32, %arg1: memref<1x20x128xf32, #tpu.memory_space<vmem>>, %arg2: memref<1x20x128xf32, #tpu.memory_space<vmem>>, %arg3: memref<8x128x128xbf16, #tpu.memory_space<vmem>>, %arg4: memref<1x128xf32, #tpu.memory_space<vmem>>, %arg5: memref<8x128x128xbf16, #tpu.memory_space<vmem>>, %arg6: memref<1x128xf32, #tpu.memory_space<vmem>>, %arg7: memref<8x128x128xbf16, #tpu.memory_space<vmem>>, %arg8: memref<1x128xf32, #tpu.memory_space<vmem>>, %arg9: memref<128x128xbf16, #tpu.memory_space<vmem>>, %arg10: memref<1x128xf32, #tpu.memory_space<vmem>>, %arg11: memref<1x1x128xf32, #tpu.memory_space<vmem>>, %arg12: memref<1x1x128xf32, #tpu.memory_space<vmem>>, %arg13: memref<24x128xf32, #tpu.memory_space<vmem>>, %arg14: memref<32x128xf32, #tpu.memory_space<vmem>>) attributes {dimension_semantics = [#tpu.dimension_semantics<parallel>], iteration_bounds = array<i64: 2>, scalar_prefetch = 0 : i64, scratch_operands = 2 : i64, tpu.core_type = #tpu.core_type<tc>, window_params = [{transform_indices = @transform_0, window_bounds = array<i64: 1, 20, 128>}, {transform_indices = @transform_1, window_bounds = array<i64: 1, 20, 128>}, {pipeline_mode = #tpu.pipeline_mode<synchronous>, transform_indices = @transform_2, window_bounds = array<i64: 8, 128, 128>}, {pipeline_mode = #tpu.pipeline_mode<synchronous>, transform_indices = @transform_3, window_bounds = array<i64: 1, 128>}, {pipeline_mode = #tpu.pipeline_mode<synchronous>, transform_indices = @transform_4, window_bounds = array<i64: 8, 128, 128>}, {pipeline_mode = #tpu.pipeline_mode<synchronous>, transform_indices = @transform_5, window_bounds = array<i64: 1, 128>}, {pipeline_mode = #tpu.pipeline_mode<synchronous>, transform_indices = @transform_6, window_bounds = array<i64: 8, 128, 128>}, {pipeline_mode = #tpu.pipeline_mode<synchronous>, transform_indices = @transform_7, window_bounds = array<i64: 1, 128>}, {pipeline_mode = #tpu.pipeline_mode<synchronous>, transform_indices = @transform_8, window_bounds = array<i64: 128, 128>}, {pipeline_mode = #tpu.pipeline_mode<synchronous>, transform_indices = @transform_9, window_bounds = array<i64: 1, 128>}, {transform_indices = @transform_10, window_bounds = array<i64: 1, 1, 128>}, {transform_indices = @transform_11, window_bounds = array<i64: 1, 1, 128>}]} {
    %cst = arith.constant 0.000000e+00 : f32
    %0 = vector.broadcast %cst : f32 to vector<24x128xf32>
    %c0 = arith.constant 0 : index
    %c0_0 = arith.constant 0 : index
    %1 = vector.load %arg13[%c0, %c0_0] : memref<24x128xf32, #tpu.memory_space<vmem>>, vector<24x128xf32>
    tpu.vector_store %arg13[%c0, %c0_0], %0 {strides = array<i32>} : memref<24x128xf32, #tpu.memory_space<vmem>>, vector<24x128xf32>,
    %cst_1 = arith.constant 0.000000e+00 : f32
    %2 = vector.broadcast %cst_1 : f32 to vector<32x128xf32>
    %c0_2 = arith.constant 0 : index
    %c0_3 = arith.constant 0 : index
    %3 = vector.load %arg14[%c0_2, %c0_3] : memref<32x128xf32, #tpu.memory_space<vmem>>, vector<32x128xf32>
    tpu.vector_store %arg14[%c0_2, %c0_3], %2 {strides = array<i32>} : memref<32x128xf32, #tpu.memory_space<vmem>>, vector<32x128xf32>,
    %c0_4 = arith.constant 0 : index
    %c0_5 = arith.constant 0 : index
    %c0_6 = arith.constant 0 : index
    %4 = vector.load %arg1[%c0_4, %c0_5, %c0_6] : memref<1x20x128xf32, #tpu.memory_space<vmem>>, vector<1x20x128xf32>
    %5 = vector.shape_cast %4 : vector<1x20x128xf32> to vector<20x128xf32>
    %c0_7 = arith.constant 0 : index
    %c0_8 = arith.constant 0 : index
    %c0_9 = arith.constant 0 : index
    %6 = vector.load %arg2[%c0_7, %c0_8, %c0_9] : memref<1x20x128xf32, #tpu.memory_space<vmem>>, vector<1x20x128xf32>
    %7 = vector.shape_cast %6 : vector<1x20x128xf32> to vector<20x128xf32>
    %cst_10 = arith.constant 0.000000e+00 : f32
    %8 = vector.broadcast %cst_10 : f32 to vector<16x128xf32>
    %9 = vector.extract_strided_slice %5 {offsets = [0, 0], sizes = [16, 128], strides = [1, 1]} : vector<20x128xf32> to vector<16x128xf32>
    %10 = arith.truncf %9 : vector<16x128xf32> to vector<16x128xbf16>
    %c0_11 = arith.constant 0 : index
    %c0_12 = arith.constant 0 : index
    %c0_13 = arith.constant 0 : index
    %11 = vector.load %arg3[%c0_11, %c0_12, %c0_13] : memref<8x128x128xbf16, #tpu.memory_space<vmem>>, vector<1x128x128xbf16>
    %12 = vector.shape_cast %11 : vector<1x128x128xbf16> to vector<128x128xbf16>
    %cst_14 = arith.constant dense<0.000000e+00> : vector<16x128xf32>
    %13 = tpu.matmul %10, %12, %cst_14 {dimension_numbers = #tpu.dot_dimension_numbers<[1], [0], [0], [1], [0, 0, 1, 1], [], []>} : vector<16x128xbf16>, vector<128x128xbf16>, vector<16x128xf32> -> vector<16x128xf32>
    %14 = arith.addf %8, %13 : vector<16x128xf32>
    %15 = vector.extract_strided_slice %7 {offsets = [0, 0], sizes = [16, 128], strides = [1, 1]} : vector<20x128xf32> to vector<16x128xf32>
    %16 = arith.truncf %15 : vector<16x128xf32> to vector<16x128xbf16>
    %c1 = arith.constant 1 : index
    %c0_15 = arith.constant 0 : index
    %c0_16 = arith.constant 0 : index
    %17 = vector.load %arg3[%c1, %c0_15, %c0_16] : memref<8x128x128xbf16, #tpu.memory_space<vmem>>, vector<1x128x128xbf16>
    %18 = vector.shape_cast %17 : vector<1x128x128xbf16> to vector<128x128xbf16>
    %cst_17 = arith.constant dense<0.000000e+00> : vector<16x128xf32>
    %19 = tpu.matmul %16, %18, %cst_17 {dimension_numbers = #tpu.dot_dimension_numbers<[1], [0], [0], [1], [0, 0, 1, 1], [], []>} : vector<16x128xbf16>, vector<128x128xbf16>, vector<16x128xf32> -> vector<16x128xf32>
    %20 = arith.addf %14, %19 : vector<16x128xf32>
    %21 = vector.extract_strided_slice %5 {offsets = [1, 0], sizes = [16, 128], strides = [1, 1]} : vector<20x128xf32> to vector<16x128xf32>
    %22 = arith.truncf %21 : vector<16x128xf32> to vector<16x128xbf16>
    %c2 = arith.constant 2 : index
    %c0_18 = arith.constant 0 : index
    %c0_19 = arith.constant 0 : index
    %23 = vector.load %arg3[%c2, %c0_18, %c0_19] : memref<8x128x128xbf16, #tpu.memory_space<vmem>>, vector<1x128x128xbf16>
    %24 = vector.shape_cast %23 : vector<1x128x128xbf16> to vector<128x128xbf16>
    %cst_20 = arith.constant dense<0.000000e+00> : vector<16x128xf32>
    %25 = tpu.matmul %22, %24, %cst_20 {dimension_numbers = #tpu.dot_dimension_numbers<[1], [0], [0], [1], [0, 0, 1, 1], [], []>} : vector<16x128xbf16>, vector<128x128xbf16>, vector<16x128xf32> -> vector<16x128xf32>
    %26 = arith.addf %20, %25 : vector<16x128xf32>
    %27 = vector.extract_strided_slice %7 {offsets = [1, 0], sizes = [16, 128], strides = [1, 1]} : vector<20x128xf32> to vector<16x128xf32>
    %28 = arith.truncf %27 : vector<16x128xf32> to vector<16x128xbf16>
    %c3 = arith.constant 3 : index
    %c0_21 = arith.constant 0 : index
    %c0_22 = arith.constant 0 : index
    %29 = vector.load %arg3[%c3, %c0_21, %c0_22] : memref<8x128x128xbf16, #tpu.memory_space<vmem>>, vector<1x128x128xbf16>
    %30 = vector.shape_cast %29 : vector<1x128x128xbf16> to vector<128x128xbf16>
    %cst_23 = arith.constant dense<0.000000e+00> : vector<16x128xf32>
    %31 = tpu.matmul %28, %30, %cst_23 {dimension_numbers = #tpu.dot_dimension_numbers<[1], [0], [0], [1], [0, 0, 1, 1], [], []>} : vector<16x128xbf16>, vector<128x128xbf16>, vector<16x128xf32> -> vector<16x128xf32>
    %32 = arith.addf %26, %31 : vector<16x128xf32>
    %33 = vector.extract_strided_slice %5 {offsets = [2, 0], sizes = [16, 128], strides = [1, 1]} : vector<20x128xf32> to vector<16x128xf32>
    %34 = arith.truncf %33 : vector<16x128xf32> to vector<16x128xbf16>
    %c4 = arith.constant 4 : index
    %c0_24 = arith.constant 0 : index
    %c0_25 = arith.constant 0 : index
    %35 = vector.load %arg3[%c4, %c0_24, %c0_25] : memref<8x128x128xbf16, #tpu.memory_space<vmem>>, vector<1x128x128xbf16>
    %36 = vector.shape_cast %35 : vector<1x128x128xbf16> to vector<128x128xbf16>
    %cst_26 = arith.constant dense<0.000000e+00> : vector<16x128xf32>
    %37 = tpu.matmul %34, %36, %cst_26 {dimension_numbers = #tpu.dot_dimension_numbers<[1], [0], [0], [1], [0, 0, 1, 1], [], []>} : vector<16x128xbf16>, vector<128x128xbf16>, vector<16x128xf32> -> vector<16x128xf32>
    %38 = arith.addf %32, %37 : vector<16x128xf32>
    %39 = vector.extract_strided_slice %7 {offsets = [2, 0], sizes = [16, 128], strides = [1, 1]} : vector<20x128xf32> to vector<16x128xf32>
    %40 = arith.truncf %39 : vector<16x128xf32> to vector<16x128xbf16>
    %c5 = arith.constant 5 : index
    %c0_27 = arith.constant 0 : index
    %c0_28 = arith.constant 0 : index
    %41 = vector.load %arg3[%c5, %c0_27, %c0_28] : memref<8x128x128xbf16, #tpu.memory_space<vmem>>, vector<1x128x128xbf16>
    %42 = vector.shape_cast %41 : vector<1x128x128xbf16> to vector<128x128xbf16>
    %cst_29 = arith.constant dense<0.000000e+00> : vector<16x128xf32>
    %43 = tpu.matmul %40, %42, %cst_29 {dimension_numbers = #tpu.dot_dimension_numbers<[1], [0], [0], [1], [0, 0, 1, 1], [], []>} : vector<16x128xbf16>, vector<128x128xbf16>, vector<16x128xf32> -> vector<16x128xf32>
    %44 = arith.addf %38, %43 : vector<16x128xf32>
    %45 = vector.extract_strided_slice %5 {offsets = [3, 0], sizes = [16, 128], strides = [1, 1]} : vector<20x128xf32> to vector<16x128xf32>
    %46 = arith.truncf %45 : vector<16x128xf32> to vector<16x128xbf16>
    %c6 = arith.constant 6 : index
    %c0_30 = arith.constant 0 : index
    %c0_31 = arith.constant 0 : index
    %47 = vector.load %arg3[%c6, %c0_30, %c0_31] : memref<8x128x128xbf16, #tpu.memory_space<vmem>>, vector<1x128x128xbf16>
    %48 = vector.shape_cast %47 : vector<1x128x128xbf16> to vector<128x128xbf16>
    %cst_32 = arith.constant dense<0.000000e+00> : vector<16x128xf32>
    %49 = tpu.matmul %46, %48, %cst_32 {dimension_numbers = #tpu.dot_dimension_numbers<[1], [0], [0], [1], [0, 0, 1, 1], [], []>} : vector<16x128xbf16>, vector<128x128xbf16>, vector<16x128xf32> -> vector<16x128xf32>
    %50 = arith.addf %44, %49 : vector<16x128xf32>
    %51 = vector.extract_strided_slice %7 {offsets = [3, 0], sizes = [16, 128], strides = [1, 1]} : vector<20x128xf32> to vector<16x128xf32>
    %52 = arith.truncf %51 : vector<16x128xf32> to vector<16x128xbf16>
    %c7 = arith.constant 7 : index
    %c0_33 = arith.constant 0 : index
    %c0_34 = arith.constant 0 : index
    %53 = vector.load %arg3[%c7, %c0_33, %c0_34] : memref<8x128x128xbf16, #tpu.memory_space<vmem>>, vector<1x128x128xbf16>
    %54 = vector.shape_cast %53 : vector<1x128x128xbf16> to vector<128x128xbf16>
    %cst_35 = arith.constant dense<0.000000e+00> : vector<16x128xf32>
    %55 = tpu.matmul %52, %54, %cst_35 {dimension_numbers = #tpu.dot_dimension_numbers<[1], [0], [0], [1], [0, 0, 1, 1], [], []>} : vector<16x128xbf16>, vector<128x128xbf16>, vector<16x128xf32> -> vector<16x128xf32>
    %56 = arith.addf %50, %55 : vector<16x128xf32>
    %c0_36 = arith.constant 0 : index
    %c0_37 = arith.constant 0 : index
    %57 = vector.load %arg4[%c0_36, %c0_37] : memref<1x128xf32, #tpu.memory_space<vmem>>, vector<1x128xf32>
    %58 = vector.broadcast %57 : vector<1x128xf32> to vector<16x128xf32>
    %59 = arith.addf %56, %58 : vector<16x128xf32>
    %cst_38 = arith.constant 0.000000e+00 : f32
    %60 = vector.broadcast %cst_38 : f32 to vector<16x128xf32>
    %61 = arith.maximumf %59, %60 : vector<16x128xf32>
    %c4_39 = arith.constant 4 : index
    %c0_40 = arith.constant 0 : index
    %62 = vector.load %arg13[%c4_39, %c0_40] : memref<24x128xf32, #tpu.memory_space<vmem>>, vector<16x128xf32>
    tpu.vector_store %arg13[%c4_39, %c0_40], %61 {strides = array<i32>} : memref<24x128xf32, #tpu.memory_space<vmem>>, vector<16x128xf32>,
    %cst_41 = arith.constant 0.000000e+00 : f32
    %63 = vector.broadcast %cst_41 : f32 to vector<17x128xf32>
    %c0_42 = arith.constant 0 : index
    %c0_43 = arith.constant 0 : index
    %64 = vector.load %arg13[%c0_42, %c0_43] : memref<24x128xf32, #tpu.memory_space<vmem>>, vector<17x128xf32>
    %65 = arith.truncf %64 : vector<17x128xf32> to vector<17x128xbf16>
    %c0_44 = arith.constant 0 : index
    %c0_45 = arith.constant 0 : index
    %c0_46 = arith.constant 0 : index
    %66 = vector.load %arg5[%c0_44, %c0_45, %c0_46] : memref<8x128x128xbf16, #tpu.memory_space<vmem>>, vector<1x128x128xbf16>
    %67 = vector.shape_cast %66 : vector<1x128x128xbf16> to vector<128x128xbf16>
    %cst_47 = arith.constant dense<0.000000e+00> : vector<17x128xf32>
    %68 = tpu.matmul %65, %67, %cst_47 {dimension_numbers = #tpu.dot_dimension_numbers<[1], [0], [0], [1], [0, 0, 1, 1], [], []>} : vector<17x128xbf16>, vector<128x128xbf16>, vector<17x128xf32> -> vector<17x128xf32>
    %69 = arith.addf %63, %68 : vector<17x128xf32>
    %c1_48 = arith.constant 1 : index
    %c0_49 = arith.constant 0 : index
    %70 = vector.load %arg13[%c1_48, %c0_49] : memref<24x128xf32, #tpu.memory_space<vmem>>, vector<17x128xf32>
    %71 = arith.truncf %70 : vector<17x128xf32> to vector<17x128xbf16>
    %c1_50 = arith.constant 1 : index
    %c0_51 = arith.constant 0 : index
    %c0_52 = arith.constant 0 : index
    %72 = vector.load %arg5[%c1_50, %c0_51, %c0_52] : memref<8x128x128xbf16, #tpu.memory_space<vmem>>, vector<1x128x128xbf16>
    %73 = vector.shape_cast %72 : vector<1x128x128xbf16> to vector<128x128xbf16>
    %cst_53 = arith.constant dense<0.000000e+00> : vector<17x128xf32>
    %74 = tpu.matmul %71, %73, %cst_53 {dimension_numbers = #tpu.dot_dimension_numbers<[1], [0], [0], [1], [0, 0, 1, 1], [], []>} : vector<17x128xbf16>, vector<128x128xbf16>, vector<17x128xf32> -> vector<17x128xf32>
    %75 = arith.addf %69, %74 : vector<17x128xf32>
    %c2_54 = arith.constant 2 : index
    %c0_55 = arith.constant 0 : index
    %76 = vector.load %arg13[%c2_54, %c0_55] : memref<24x128xf32, #tpu.memory_space<vmem>>, vector<17x128xf32>
    %77 = arith.truncf %76 : vector<17x128xf32> to vector<17x128xbf16>
    %c2_56 = arith.constant 2 : index
    %c0_57 = arith.constant 0 : index
    %c0_58 = arith.constant 0 : index
    %78 = vector.load %arg5[%c2_56, %c0_57, %c0_58] : memref<8x128x128xbf16, #tpu.memory_space<vmem>>, vector<1x128x128xbf16>
    %79 = vector.shape_cast %78 : vector<1x128x128xbf16> to vector<128x128xbf16>
    %cst_59 = arith.constant dense<0.000000e+00> : vector<17x128xf32>
    %80 = tpu.matmul %77, %79, %cst_59 {dimension_numbers = #tpu.dot_dimension_numbers<[1], [0], [0], [1], [0, 0, 1, 1], [], []>} : vector<17x128xbf16>, vector<128x128xbf16>, vector<17x128xf32> -> vector<17x128xf32>
    %81 = arith.addf %75, %80 : vector<17x128xf32>
    %c3_60 = arith.constant 3 : index
    %c0_61 = arith.constant 0 : index
    %82 = vector.load %arg13[%c3_60, %c0_61] : memref<24x128xf32, #tpu.memory_space<vmem>>, vector<17x128xf32>
    %83 = arith.truncf %82 : vector<17x128xf32> to vector<17x128xbf16>
    %c3_62 = arith.constant 3 : index
    %c0_63 = arith.constant 0 : index
    %c0_64 = arith.constant 0 : index
    %84 = vector.load %arg5[%c3_62, %c0_63, %c0_64] : memref<8x128x128xbf16, #tpu.memory_space<vmem>>, vector<1x128x128xbf16>
    %85 = vector.shape_cast %84 : vector<1x128x128xbf16> to vector<128x128xbf16>
    %cst_65 = arith.constant dense<0.000000e+00> : vector<17x128xf32>
    %86 = tpu.matmul %83, %85, %cst_65 {dimension_numbers = #tpu.dot_dimension_numbers<[1], [0], [0], [1], [0, 0, 1, 1], [], []>} : vector<17x128xbf16>, vector<128x128xbf16>, vector<17x128xf32> -> vector<17x128xf32>
    %87 = arith.addf %81, %86 : vector<17x128xf32>
    %c4_66 = arith.constant 4 : index
    %c0_67 = arith.constant 0 : index
    %88 = vector.load %arg13[%c4_66, %c0_67] : memref<24x128xf32, #tpu.memory_space<vmem>>, vector<17x128xf32>
    %89 = arith.truncf %88 : vector<17x128xf32> to vector<17x128xbf16>
    %c4_68 = arith.constant 4 : index
    %c0_69 = arith.constant 0 : index
    %c0_70 = arith.constant 0 : index
    %90 = vector.load %arg5[%c4_68, %c0_69, %c0_70] : memref<8x128x128xbf16, #tpu.memory_space<vmem>>, vector<1x128x128xbf16>
    %91 = vector.shape_cast %90 : vector<1x128x128xbf16> to vector<128x128xbf16>
    %cst_71 = arith.constant dense<0.000000e+00> : vector<17x128xf32>
    %92 = tpu.matmul %89, %91, %cst_71 {dimension_numbers = #tpu.dot_dimension_numbers<[1], [0], [0], [1], [0, 0, 1, 1], [], []>} : vector<17x128xbf16>, vector<128x128xbf16>, vector<17x128xf32> -> vector<17x128xf32>
    %93 = arith.addf %87, %92 : vector<17x128xf32>
    %c5_72 = arith.constant 5 : index
    %c0_73 = arith.constant 0 : index
    %94 = vector.load %arg13[%c5_72, %c0_73] : memref<24x128xf32, #tpu.memory_space<vmem>>, vector<17x128xf32>
    %95 = arith.truncf %94 : vector<17x128xf32> to vector<17x128xbf16>
    %c5_74 = arith.constant 5 : index
    %c0_75 = arith.constant 0 : index
    %c0_76 = arith.constant 0 : index
    %96 = vector.load %arg5[%c5_74, %c0_75, %c0_76] : memref<8x128x128xbf16, #tpu.memory_space<vmem>>, vector<1x128x128xbf16>
    %97 = vector.shape_cast %96 : vector<1x128x128xbf16> to vector<128x128xbf16>
    %cst_77 = arith.constant dense<0.000000e+00> : vector<17x128xf32>
    %98 = tpu.matmul %95, %97, %cst_77 {dimension_numbers = #tpu.dot_dimension_numbers<[1], [0], [0], [1], [0, 0, 1, 1], [], []>} : vector<17x128xbf16>, vector<128x128xbf16>, vector<17x128xf32> -> vector<17x128xf32>
    %99 = arith.addf %93, %98 : vector<17x128xf32>
    %c6_78 = arith.constant 6 : index
    %c0_79 = arith.constant 0 : index
    %100 = vector.load %arg13[%c6_78, %c0_79] : memref<24x128xf32, #tpu.memory_space<vmem>>, vector<17x128xf32>
    %101 = arith.truncf %100 : vector<17x128xf32> to vector<17x128xbf16>
    %c6_80 = arith.constant 6 : index
    %c0_81 = arith.constant 0 : index
    %c0_82 = arith.constant 0 : index
    %102 = vector.load %arg5[%c6_80, %c0_81, %c0_82] : memref<8x128x128xbf16, #tpu.memory_space<vmem>>, vector<1x128x128xbf16>
    %103 = vector.shape_cast %102 : vector<1x128x128xbf16> to vector<128x128xbf16>
    %cst_83 = arith.constant dense<0.000000e+00> : vector<17x128xf32>
    %104 = tpu.matmul %101, %103, %cst_83 {dimension_numbers = #tpu.dot_dimension_numbers<[1], [0], [0], [1], [0, 0, 1, 1], [], []>} : vector<17x128xbf16>, vector<128x128xbf16>, vector<17x128xf32> -> vector<17x128xf32>
    %105 = arith.addf %99, %104 : vector<17x128xf32>
    %c7_84 = arith.constant 7 : index
    %c0_85 = arith.constant 0 : index
    %106 = vector.load %arg13[%c7_84, %c0_85] : memref<24x128xf32, #tpu.memory_space<vmem>>, vector<17x128xf32>
    %107 = arith.truncf %106 : vector<17x128xf32> to vector<17x128xbf16>
    %c7_86 = arith.constant 7 : index
    %c0_87 = arith.constant 0 : index
    %c0_88 = arith.constant 0 : index
    %108 = vector.load %arg5[%c7_86, %c0_87, %c0_88] : memref<8x128x128xbf16, #tpu.memory_space<vmem>>, vector<1x128x128xbf16>
    %109 = vector.shape_cast %108 : vector<1x128x128xbf16> to vector<128x128xbf16>
    %cst_89 = arith.constant dense<0.000000e+00> : vector<17x128xf32>
    %110 = tpu.matmul %107, %109, %cst_89 {dimension_numbers = #tpu.dot_dimension_numbers<[1], [0], [0], [1], [0, 0, 1, 1], [], []>} : vector<17x128xbf16>, vector<128x128xbf16>, vector<17x128xf32> -> vector<17x128xf32>
    %111 = arith.addf %105, %110 : vector<17x128xf32>
    %c0_90 = arith.constant 0 : index
    %c0_91 = arith.constant 0 : index
    %112 = vector.load %arg6[%c0_90, %c0_91] : memref<1x128xf32, #tpu.memory_space<vmem>>, vector<1x128xf32>
    %113 = vector.broadcast %112 : vector<1x128xf32> to vector<17x128xf32>
    %114 = arith.addf %111, %113 : vector<17x128xf32>
    %cst_92 = arith.constant 0.000000e+00 : f32
    %115 = vector.broadcast %cst_92 : f32 to vector<17x128xf32>
    %116 = arith.maximumf %114, %115 : vector<17x128xf32>
    %c4_93 = arith.constant 4 : index
    %c0_94 = arith.constant 0 : index
    %117 = vector.load %arg14[%c4_93, %c0_94] : memref<32x128xf32, #tpu.memory_space<vmem>>, vector<17x128xf32>
    tpu.vector_store %arg14[%c4_93, %c0_94], %116 {strides = array<i32>} : memref<32x128xf32, #tpu.memory_space<vmem>>, vector<17x128xf32>,
    %cst_95 = arith.constant 0.000000e+00 : f32
    %118 = vector.broadcast %cst_95 : f32 to vector<18x128xf32>
    %c0_96 = arith.constant 0 : index
    %c0_97 = arith.constant 0 : index
    %119 = vector.load %arg14[%c0_96, %c0_97] : memref<32x128xf32, #tpu.memory_space<vmem>>, vector<18x128xf32>
    %120 = arith.truncf %119 : vector<18x128xf32> to vector<18x128xbf16>
    %c0_98 = arith.constant 0 : index
    %c0_99 = arith.constant 0 : index
    %c0_100 = arith.constant 0 : index
    %121 = vector.load %arg7[%c0_98, %c0_99, %c0_100] : memref<8x128x128xbf16, #tpu.memory_space<vmem>>, vector<1x128x128xbf16>
    %122 = vector.shape_cast %121 : vector<1x128x128xbf16> to vector<128x128xbf16>
    %cst_101 = arith.constant dense<0.000000e+00> : vector<18x128xf32>
    %123 = tpu.matmul %120, %122, %cst_101 {dimension_numbers = #tpu.dot_dimension_numbers<[1], [0], [0], [1], [0, 0, 1, 1], [], []>} : vector<18x128xbf16>, vector<128x128xbf16>, vector<18x128xf32> -> vector<18x128xf32>
    %124 = arith.addf %118, %123 : vector<18x128xf32>
    %c1_102 = arith.constant 1 : index
    %c0_103 = arith.constant 0 : index
    %125 = vector.load %arg14[%c1_102, %c0_103] : memref<32x128xf32, #tpu.memory_space<vmem>>, vector<18x128xf32>
    %126 = arith.truncf %125 : vector<18x128xf32> to vector<18x128xbf16>
    %c1_104 = arith.constant 1 : index
    %c0_105 = arith.constant 0 : index
    %c0_106 = arith.constant 0 : index
    %127 = vector.load %arg7[%c1_104, %c0_105, %c0_106] : memref<8x128x128xbf16, #tpu.memory_space<vmem>>, vector<1x128x128xbf16>
    %128 = vector.shape_cast %127 : vector<1x128x128xbf16> to vector<128x128xbf16>
    %cst_107 = arith.constant dense<0.000000e+00> : vector<18x128xf32>
    %129 = tpu.matmul %126, %128, %cst_107 {dimension_numbers = #tpu.dot_dimension_numbers<[1], [0], [0], [1], [0, 0, 1, 1], [], []>} : vector<18x128xbf16>, vector<128x128xbf16>, vector<18x128xf32> -> vector<18x128xf32>
    %130 = arith.addf %124, %129 : vector<18x128xf32>
    %c2_108 = arith.constant 2 : index
    %c0_109 = arith.constant 0 : index
    %131 = vector.load %arg14[%c2_108, %c0_109] : memref<32x128xf32, #tpu.memory_space<vmem>>, vector<18x128xf32>
    %132 = arith.truncf %131 : vector<18x128xf32> to vector<18x128xbf16>
    %c2_110 = arith.constant 2 : index
    %c0_111 = arith.constant 0 : index
    %c0_112 = arith.constant 0 : index
    %133 = vector.load %arg7[%c2_110, %c0_111, %c0_112] : memref<8x128x128xbf16, #tpu.memory_space<vmem>>, vector<1x128x128xbf16>
    %134 = vector.shape_cast %133 : vector<1x128x128xbf16> to vector<128x128xbf16>
    %cst_113 = arith.constant dense<0.000000e+00> : vector<18x128xf32>
    %135 = tpu.matmul %132, %134, %cst_113 {dimension_numbers = #tpu.dot_dimension_numbers<[1], [0], [0], [1], [0, 0, 1, 1], [], []>} : vector<18x128xbf16>, vector<128x128xbf16>, vector<18x128xf32> -> vector<18x128xf32>
    %136 = arith.addf %130, %135 : vector<18x128xf32>
    %c3_114 = arith.constant 3 : index
    %c0_115 = arith.constant 0 : index
    %137 = vector.load %arg14[%c3_114, %c0_115] : memref<32x128xf32, #tpu.memory_space<vmem>>, vector<18x128xf32>
    %138 = arith.truncf %137 : vector<18x128xf32> to vector<18x128xbf16>
    %c3_116 = arith.constant 3 : index
    %c0_117 = arith.constant 0 : index
    %c0_118 = arith.constant 0 : index
    %139 = vector.load %arg7[%c3_116, %c0_117, %c0_118] : memref<8x128x128xbf16, #tpu.memory_space<vmem>>, vector<1x128x128xbf16>
    %140 = vector.shape_cast %139 : vector<1x128x128xbf16> to vector<128x128xbf16>
    %cst_119 = arith.constant dense<0.000000e+00> : vector<18x128xf32>
    %141 = tpu.matmul %138, %140, %cst_119 {dimension_numbers = #tpu.dot_dimension_numbers<[1], [0], [0], [1], [0, 0, 1, 1], [], []>} : vector<18x128xbf16>, vector<128x128xbf16>, vector<18x128xf32> -> vector<18x128xf32>
    %142 = arith.addf %136, %141 : vector<18x128xf32>
    %c4_120 = arith.constant 4 : index
    %c0_121 = arith.constant 0 : index
    %143 = vector.load %arg14[%c4_120, %c0_121] : memref<32x128xf32, #tpu.memory_space<vmem>>, vector<18x128xf32>
    %144 = arith.truncf %143 : vector<18x128xf32> to vector<18x128xbf16>
    %c4_122 = arith.constant 4 : index
    %c0_123 = arith.constant 0 : index
    %c0_124 = arith.constant 0 : index
    %145 = vector.load %arg7[%c4_122, %c0_123, %c0_124] : memref<8x128x128xbf16, #tpu.memory_space<vmem>>, vector<1x128x128xbf16>
    %146 = vector.shape_cast %145 : vector<1x128x128xbf16> to vector<128x128xbf16>
    %cst_125 = arith.constant dense<0.000000e+00> : vector<18x128xf32>
    %147 = tpu.matmul %144, %146, %cst_125 {dimension_numbers = #tpu.dot_dimension_numbers<[1], [0], [0], [1], [0, 0, 1, 1], [], []>} : vector<18x128xbf16>, vector<128x128xbf16>, vector<18x128xf32> -> vector<18x128xf32>
    %148 = arith.addf %142, %147 : vector<18x128xf32>
    %c5_126 = arith.constant 5 : index
    %c0_127 = arith.constant 0 : index
    %149 = vector.load %arg14[%c5_126, %c0_127] : memref<32x128xf32, #tpu.memory_space<vmem>>, vector<18x128xf32>
    %150 = arith.truncf %149 : vector<18x128xf32> to vector<18x128xbf16>
    %c5_128 = arith.constant 5 : index
    %c0_129 = arith.constant 0 : index
    %c0_130 = arith.constant 0 : index
    %151 = vector.load %arg7[%c5_128, %c0_129, %c0_130] : memref<8x128x128xbf16, #tpu.memory_space<vmem>>, vector<1x128x128xbf16>
    %152 = vector.shape_cast %151 : vector<1x128x128xbf16> to vector<128x128xbf16>
    %cst_131 = arith.constant dense<0.000000e+00> : vector<18x128xf32>
    %153 = tpu.matmul %150, %152, %cst_131 {dimension_numbers = #tpu.dot_dimension_numbers<[1], [0], [0], [1], [0, 0, 1, 1], [], []>} : vector<18x128xbf16>, vector<128x128xbf16>, vector<18x128xf32> -> vector<18x128xf32>
    %154 = arith.addf %148, %153 : vector<18x128xf32>
    %c6_132 = arith.constant 6 : index
    %c0_133 = arith.constant 0 : index
    %155 = vector.load %arg14[%c6_132, %c0_133] : memref<32x128xf32, #tpu.memory_space<vmem>>, vector<18x128xf32>
    %156 = arith.truncf %155 : vector<18x128xf32> to vector<18x128xbf16>
    %c6_134 = arith.constant 6 : index
    %c0_135 = arith.constant 0 : index
    %c0_136 = arith.constant 0 : index
    %157 = vector.load %arg7[%c6_134, %c0_135, %c0_136] : memref<8x128x128xbf16, #tpu.memory_space<vmem>>, vector<1x128x128xbf16>
    %158 = vector.shape_cast %157 : vector<1x128x128xbf16> to vector<128x128xbf16>
    %cst_137 = arith.constant dense<0.000000e+00> : vector<18x128xf32>
    %159 = tpu.matmul %156, %158, %cst_137 {dimension_numbers = #tpu.dot_dimension_numbers<[1], [0], [0], [1], [0, 0, 1, 1], [], []>} : vector<18x128xbf16>, vector<128x128xbf16>, vector<18x128xf32> -> vector<18x128xf32>
    %160 = arith.addf %154, %159 : vector<18x128xf32>
    %c7_138 = arith.constant 7 : index
    %c0_139 = arith.constant 0 : index
    %161 = vector.load %arg14[%c7_138, %c0_139] : memref<32x128xf32, #tpu.memory_space<vmem>>, vector<18x128xf32>
    %162 = arith.truncf %161 : vector<18x128xf32> to vector<18x128xbf16>
    %c7_140 = arith.constant 7 : index
    %c0_141 = arith.constant 0 : index
    %c0_142 = arith.constant 0 : index
    %163 = vector.load %arg7[%c7_140, %c0_141, %c0_142] : memref<8x128x128xbf16, #tpu.memory_space<vmem>>, vector<1x128x128xbf16>
    %164 = vector.shape_cast %163 : vector<1x128x128xbf16> to vector<128x128xbf16>
    %cst_143 = arith.constant dense<0.000000e+00> : vector<18x128xf32>
    %165 = tpu.matmul %162, %164, %cst_143 {dimension_numbers = #tpu.dot_dimension_numbers<[1], [0], [0], [1], [0, 0, 1, 1], [], []>} : vector<18x128xbf16>, vector<128x128xbf16>, vector<18x128xf32> -> vector<18x128xf32>
    %166 = arith.addf %160, %165 : vector<18x128xf32>
    %c0_144 = arith.constant 0 : index
    %c0_145 = arith.constant 0 : index
    %167 = vector.load %arg8[%c0_144, %c0_145] : memref<1x128xf32, #tpu.memory_space<vmem>>, vector<1x128xf32>
    %168 = vector.broadcast %167 : vector<1x128xf32> to vector<18x128xf32>
    %169 = arith.addf %166, %168 : vector<18x128xf32>
    %cst_146 = arith.constant 0.000000e+00 : f32
    %170 = vector.broadcast %cst_146 : f32 to vector<18x128xf32>
    %171 = arith.maximumf %169, %170 : vector<18x128xf32>
    %cst_147 = arith.constant dense<0xFF800000> : vector<128xf32>
    %172 = vector.multi_reduction <maximumf>, %171, %cst_147 [0] : vector<18x128xf32> to vector<128xf32>
    %173 = vector.shape_cast %172 : vector<128xf32> to vector<1x128xf32>
    %c0_148 = arith.constant 0 : index
    %c0_149 = arith.constant 0 : index
    %c0_150 = arith.constant 0 : index
    %174 = vector.load %arg12[%c0_148, %c0_149, %c0_150] : memref<1x1x128xf32, #tpu.memory_space<vmem>>, vector<1x1x128xf32>
    %175 = vector.shape_cast %174 : vector<1x1x128xf32> to vector<1x128xf32>
    %176 = vector.shape_cast %173 : vector<1x128xf32> to vector<1x1x128xf32>
    tpu.vector_store %arg12[%c0_148, %c0_149, %c0_150], %176 {strides = array<i32>} : memref<1x1x128xf32, #tpu.memory_space<vmem>>, vector<1x1x128xf32>,
    %177 = arith.truncf %173 : vector<1x128xf32> to vector<1x128xbf16>
    %c0_151 = arith.constant 0 : index
    %c0_152 = arith.constant 0 : index
    %178 = vector.load %arg9[%c0_151, %c0_152] : memref<128x128xbf16, #tpu.memory_space<vmem>>, vector<128x128xbf16>
    %cst_153 = arith.constant dense<0.000000e+00> : vector<1x128xf32>
    %179 = tpu.matmul %177, %178, %cst_153 {dimension_numbers = #tpu.dot_dimension_numbers<[1], [0], [0], [1], [0, 0, 1, 1], [], []>} : vector<1x128xbf16>, vector<128x128xbf16>, vector<1x128xf32> -> vector<1x128xf32>
    %c0_154 = arith.constant 0 : index
    %c0_155 = arith.constant 0 : index
    %180 = vector.load %arg10[%c0_154, %c0_155] : memref<1x128xf32, #tpu.memory_space<vmem>>, vector<1x128xf32>
    %181 = arith.addf %179, %180 : vector<1x128xf32>
    %c0_156 = arith.constant 0 : index
    %c0_157 = arith.constant 0 : index
    %c0_158 = arith.constant 0 : index
    %182 = vector.load %arg11[%c0_156, %c0_157, %c0_158] : memref<1x1x128xf32, #tpu.memory_space<vmem>>, vector<1x1x128xf32>
    %183 = vector.shape_cast %182 : vector<1x1x128xf32> to vector<1x128xf32>
    %184 = vector.shape_cast %181 : vector<1x128xf32> to vector<1x1x128xf32>
    tpu.vector_store %arg11[%c0_156, %c0_157, %c0_158], %184 {strides = array<i32>} : memref<1x1x128xf32, #tpu.memory_space<vmem>>, vector<1x1x128xf32>,
    return
  }
  func.func @transform_0(%arg0: i32) -> (i32, i32, i32) {
    %c0_i32 = arith.constant 0 : i32
    %c0_i32_0 = arith.constant 0 : i32
    %c0_i32_1 = arith.constant 0 : i32
    return %arg0, %c0_i32, %c0_i32_0 : i32, i32, i32
  }
  func.func @transform_1(%arg0: i32) -> (i32, i32, i32) {
    %c0_i32 = arith.constant 0 : i32
    %c0_i32_0 = arith.constant 0 : i32
    %c0_i32_1 = arith.constant 0 : i32
    return %arg0, %c0_i32, %c0_i32_0 : i32, i32, i32
  }
  func.func @transform_2(%arg0: i32) -> (i32, i32, i32) {
    %c0_i32 = arith.constant 0 : i32
    %c0_i32_0 = arith.constant 0 : i32
    %c0_i32_1 = arith.constant 0 : i32
    %c0_i32_2 = arith.constant 0 : i32
    return %c0_i32, %c0_i32_0, %c0_i32_1 : i32, i32, i32
  }
  func.func @transform_3(%arg0: i32) -> (i32, i32) {
    %c0_i32 = arith.constant 0 : i32
    %c0_i32_0 = arith.constant 0 : i32
    %c0_i32_1 = arith.constant 0 : i32
    return %c0_i32, %c0_i32_0 : i32, i32
  }
  func.func @transform_4(%arg0: i32) -> (i32, i32, i32) {
    %c0_i32 = arith.constant 0 : i32
    %c0_i32_0 = arith.constant 0 : i32
    %c0_i32_1 = arith.constant 0 : i32
    %c0_i32_2 = arith.constant 0 : i32
    return %c0_i32, %c0_i32_0, %c0_i32_1 : i32, i32, i32
  }
  func.func @transform_5(%arg0: i32) -> (i32, i32) {
    %c0_i32 = arith.constant 0 : i32
    %c0_i32_0 = arith.constant 0 : i32
    %c0_i32_1 = arith.constant 0 : i32
    return %c0_i32, %c0_i32_0 : i32, i32
  }
  func.func @transform_6(%arg0: i32) -> (i32, i32, i32) {
    %c0_i32 = arith.constant 0 : i32
    %c0_i32_0 = arith.constant 0 : i32
    %c0_i32_1 = arith.constant 0 : i32
    %c0_i32_2 = arith.constant 0 : i32
    return %c0_i32, %c0_i32_0, %c0_i32_1 : i32, i32, i32
  }
  func.func @transform_7(%arg0: i32) -> (i32, i32) {
    %c0_i32 = arith.constant 0 : i32
    %c0_i32_0 = arith.constant 0 : i32
    %c0_i32_1 = arith.constant 0 : i32
    return %c0_i32, %c0_i32_0 : i32, i32
  }
  func.func @transform_8(%arg0: i32) -> (i32, i32) {
    %c0_i32 = arith.constant 0 : i32
    %c0_i32_0 = arith.constant 0 : i32
    %c0_i32_1 = arith.constant 0 : i32
    return %c0_i32, %c0_i32_0 : i32, i32
  }
  func.func @transform_9(%arg0: i32) -> (i32, i32) {
    %c0_i32 = arith.constant 0 : i32
    %c0_i32_0 = arith.constant 0 : i32
    %c0_i32_1 = arith.constant 0 : i32
    return %c0_i32, %c0_i32_0 : i32, i32
  }
  func.func @transform_10(%arg0: i32) -> (i32, i32, i32) {
    %c0_i32 = arith.constant 0 : i32
    %c0_i32_0 = arith.constant 0 : i32
    %c0_i32_1 = arith.constant 0 : i32
    return %arg0, %c0_i32, %c0_i32_0 : i32, i32, i32
  }
  func.func @transform_11(%arg0: i32) -> (i32, i32, i32) {
    %c0_i32 = arith.constant 0 : i32
    %c0_i32_0 = arith.constant 0 : i32
    %c0_i32_1 = arith.constant 0 : i32
    return %arg0, %c0_i32, %c0_i32_0 : i32, i32, i32
  }
}

</mosaic_0001>

<bundles_post_ra>
// kernel: sub.1
= control target key start
LH: loop header
LB: loop body
LE: loop exit
PB: predicated region body
PF: predicated region fallthrough
CT: control target
= control target key end

     0   :  { %s20_s0 = inlined_call_operand.<no memory space> [shape: f32[], index: 0, kind: input, shape index: {}]   ;;  %s21_s1 = inlined_call_operand.vmem [shape: f32[32], index: 1, kind: output, shape index: {}]  }
   0x1   :  { %v2_v0 = vstv %s20_s0 }
   0x2   :  { %3 = vst [vmem:[%s21_s1] sm:$0x1] %v2_v0 }

// kernel: _lambda_.1
= control target key start
LH: loop header
LB: loop body
LE: loop exit
PB: predicated region body
PF: predicated region fallthrough
CT: control target
= control target key end

     0   :  { %s5587_s0 = inlined_call_operand.vmem [shape: f32[2,20,128], index: 0, kind: input, shape index: {}]   ;;  %s5588_s1 = inlined_call_operand.vmem [shape: f32[2,20,128], index: 1, kind: input, shape index: {}]   ;;  %s5589_s2 = inlined_call_operand.hbm [shape: bf16[8,128,128], index: 2, kind: input, shape index: {}]   ;;  %s5590_s3 = inlined_call_operand.vmem [shape: f32[1,128], index: 3, kind: input, shape index: {}]   ;;  %s5591_s4 = inlined_call_operand.hbm [shape: bf16[8,128,128], index: 4, kind: input, shape index: {}]   ;;  %s5592_s5 = inlined_call_operand.vmem [shape: f32[1,128], index: 5, kind: input, shape index: {}, may-alias: {5,7}]   ;;  %s5593_s6 = inlined_call_operand.hbm [shape: bf16[8,128,128], index: 6, kind: input, shape index: {}]   ;;  %s5594_s7 = inlined_call_operand.vmem [shape: f32[1,128], index: 7, kind: input, shape index: {}, may-alias: {5,7}]   ;;  %s5595_s8 = inlined_call_operand.vmem [shape: bf16[128,128], index: 8, kind: input, shape index: {}]   ;;  %s5596_s9 = inlined_call_operand.vmem [shape: f32[1,128], index: 9, kind: input, shape index: {}]   ;;  %s5597_s10 = inlined_call_operand.hbm [shape: f32[2,1,128], index: 10, kind: output, shape index: {0}]   ;;  %s5598_s11 = inlined_call_operand.hbm [shape: f32[2,1,128], index: 11, kind: output, shape index: {1}]  }
   0x1   :  { %5609 = sst [smem:[#allocation23_spill]] %s5597_s10 }
   0x2   :  { %17 = vsyncpa [#allocation5], 0 }
   0x3   :  { %18 = vsyncpa [#allocation8], 0 }
   0x4   :  { %19 = vsyncpa [#allocation6], 0 }
   0x5   :  { %21 = vsyncpa [#allocation6 + $0x1], 0 }
   0x6   :  { %22 = vsyncpa [#allocation12], 0 }
   0x7   :  { %24 = vsyncpa [#allocation12 + $0x1], 0  ;;  %s5133_s17 = smov 0   ;;  %s5135_s18 = smov 0  }
   0x8   :  { %s5137_s19 = smov 0   ;;  %s5139_s20 = smov 0  }
   0x9 LB: > { %5610 = sst [smem:[#allocation17_spill]] %s5050_s17  ;;  %s5154_s21 = sadd.s32 4294967295, %s5062_s20   ;;  %s5062_s20 = sphi %s5139_s20, %s5632_s20   ;;  %s5058_s19 = sphi %s5137_s19, %s5634_s19   ;;  %s5054_s18 = sphi %s5135_s18, %s5636_s18   ;;  %s5050_s17 = sphi %s5133_s17, %s5635_s17  }
   0xa   : > { %5611 = sst [smem:[#allocation18_spill]] %s5058_s19  ;;  %s3634_s22 = sadd.s32 4294967294, %s5062_s20  }
   0xb   : > { %5612 = sst [smem:[#allocation19_spill]] %s5062_s20  ;;  %s5158_s23 = sadd.s32 1, %s5062_s20  }
   0xc   : > { %5613 = sst [smem:[#allocation20_spill]] %s5158_s23  ;;  %s257_s24 = sadd.s32 1, %s5058_s19 }
   0xd   : > { %s254_s25 = ssub.s32 %s5062_s20, %s5158_s23  ;;  %p267_p0 = scmp.ne.s32.totalorder %s5058_s19, %s5054_s18 }
   0xe   : > { %p255_p1 = scmp.eq.s32.totalorder %s254_s25, 0  ;;  %p268_p2 = scmp.eq.s32.totalorder %s5154_s21, 1 }
   0xf   : > { %p273_p3 = scmp.ne.s32.totalorder %s5054_s18, %s5050_s17  ;;  %p274_p4 = scmp.eq.s32.totalorder %s3634_s22, 1 }
  0x10   : > { %s5169_s26 = scalar_select %p255_p1, %s5058_s19, %s257_s24  }
  0x11   : > { %p5171_p5 = por %p268_p2, %p267_p0  ;;  %p5175_p6 = por %p274_p4, %p273_p3 }
  0x12   : > { %5614 = sst [smem:[#allocation21_spill]] %s5169_s26  ;;  %p3635_p7 = scmp.ge.s32.totalorder %s5062_s20, 1 }
  0x13   : > { %s5615_s27 = scalar_select %p5171_p5, 1, 0 }
  0x14   : > { %s5616_s28 = scalar_select %p5175_p6, 1, 0 }
  0x15   : > { %p307_p8 = scmp.lt.s32.totalorder %s5062_s20, 3  ;;  %p5602_p9 = scmp.eq.s32.totalorder %s5154_s21, 0 }
  0x16   : > { %5617 = sst [smem:[#allocation22_spill]] %s5616_s28  ;;  %s5064_s30 = smov [#allocation7]  }
  0x17   : > { %p5182_p10 = pnand %p3635_p7, %p307_p8  ;;  %s335_s12 = sshll.u32 %s5064_s30, 4  ;;  %s5188_s12 = int_to_ptr.vmem [resolvable:$true] %s335_s12 }
  0x18   : > { %s5065_s14 = smov [#allocation4]   ;;  %s5066_s16 = smov [#allocation9]  }
  0x19   : > { %s5618_s29 = scalar_select %p5182_p10, 1, 0 }
  0x1a   : > { %p4611_p11 = pneg %p5182_p10  ;;  %s319_s15 = sshll.u32 %s5065_s14, 4  ;;  %s5196_s15 = int_to_ptr.vmem [resolvable:$true] %s319_s15 }
  0x1b   : > { %s5198_s22 = sshll.u32 %s5066_s16, 4  ;;  %s4876_s26 = scalar_lea.hbm %s5591_s4, 8192  ;;  %s352_s22 = int_to_ptr.vmem [resolvable:$true] %s5198_s22 }
  0x1c   : > { %p5192_p12 = pnand %p5602_p9, %p4611_p11  ;;  %p4877_p13 = scmp.ne.s32.totalorder %s5591_s4, %s4876_s26 }
  0x1d   : > { %p4883_p3 = scmp.lt.u32.totalorder %s4876_s26, %s5591_s4 }
  0x1e   : > { %p5208_p0 = pneg %p5192_p12 }
  0x20   : > { %p4879_p1 = pnand %p5208_p0, %p4877_p13 }
  0x22   : > { %p4880_p2 = pneg %p4879_p1 }
  0x24   : > { %p4885_p4 = pnand %p4883_p3, %p4880_p2 }
  0x26   : > { %4888 = shalt.err (!%p4885_p4)
}
  0x27   : > { %s4889_s19 = scalar_lea.vmem %s5188_s12, 8192  ;;  %p4897_p9 = scmp.lt.s32.totalorder %s5188_s12, %s5188_s12 }
  0x28   : > { %p4890_p7 = scmp.ne.s32.totalorder %s5188_s12, %s4889_s19  ;;  %p4898_p6 = scmp.lt.s32.totalorder %s4889_s19, %s4889_s19 }
  0x2a   : > { %p4892_p8 = pnand %p4890_p7, %p5208_p0  ;;  %p4899_p13 = por %p4898_p6, %p4897_p9 }
  0x2c   : > { %p4893_p11 = pneg %p4892_p8 }
  0x2e   : > { %p4900_p1 = pnand %p4899_p13, %p4893_p11 }
  0x30   : > { %4903 = shalt.err (!%p4900_p1)
}
  0x31   : > { %s5067_s24 = smov 64   ;;  %s5068_s26 = smov 4  }
  0x32   : > { %4617 = dma.hbm_to_vmem [thread:$0]  (!%p5192_p12), %s5591_s4, 8192, %s5188_s12, [#allocation8], %s5067_s24, %s5067_s24, %s5068_s26  }
  0x33   : > { %s4904_s19 = scalar_lea.hbm %s5589_s2, 8192 }
  0x34   : > { %p4905_p6 = scmp.ne.s32.totalorder %s5589_s2, %s4904_s19  ;;  %p4911_p3 = scmp.lt.u32.totalorder %s4904_s19, %s5589_s2 }
  0x36   : > { %p4907_p9 = pnand %p4905_p6, %p5208_p0 }
  0x38   : > { %p4908_p2 = pneg %p4907_p9 }
  0x3a   : > { %p4913_p4 = pnand %p4911_p3, %p4908_p2 }
  0x3c   : > { %4916 = shalt.err (!%p4913_p4)
}
  0x3d   : > { %s4917_s12 = scalar_lea.vmem %s5196_s15, 8192  ;;  %p4925_p13 = scmp.lt.s32.totalorder %s5196_s15, %s5196_s15 }
  0x3e   : > { %p4918_p7 = scmp.ne.s32.totalorder %s5196_s15, %s4917_s12  ;;  %p4926_p1 = scmp.lt.s32.totalorder %s4917_s12, %s4917_s12 }
  0x40   : > { %p4920_p8 = pnand %p4918_p7, %p5208_p0  ;;  %p4927_p6 = por %p4926_p1, %p4925_p13 }
  0x42   : > { %p4921_p11 = pneg %p4920_p8 }
  0x44   : > { %p4928_p9 = pnand %p4927_p6, %p4921_p11 }
  0x46   : > { %4931 = shalt.err (!%p4928_p9)
}
  0x47   : > { %4614 = dma.hbm_to_vmem [thread:$0]  (!%p5192_p12), %s5589_s2, 8192, %s5196_s15, [#allocation5], %s5067_s24, %s5067_s24, %s5068_s26  }
  0x48   : > { %s4932_s25 = scalar_lea.hbm %s5593_s6, 8192 }
  0x49   : > { %p4933_p2 = scmp.ne.s32.totalorder %s5593_s6, %s4932_s25  ;;  %p4939_p7 = scmp.lt.u32.totalorder %s4932_s25, %s5593_s6 }
  0x4b   : > { %p4935_p3 = pnand %p4933_p2, %p5208_p0 }
  0x4d   : > { %p4936_p4 = pneg %p4935_p3 }
  0x4f   : > { %p4941_p8 = pnand %p4939_p7, %p4936_p4 }
  0x51   : > { %4944 = shalt.err (!%p4941_p8)
}
  0x52   : > { %s4945_s12 = scalar_lea.vmem %s352_s22, 8192  ;;  %p4953_p6 = scmp.lt.s32.totalorder %s352_s22, %s352_s22 }
  0x53   : > { %p4946_p11 = scmp.ne.s32.totalorder %s352_s22, %s4945_s12  ;;  %p4954_p9 = scmp.lt.s32.totalorder %s4945_s12, %s4945_s12 }
  0x55   : > { %p4948_p13 = pnand %p4946_p11, %p5208_p0  ;;  %p4955_p5 = por %p4954_p9, %p4953_p6 }
  0x57   : > { %p4949_p1 = pneg %p4948_p13 }
  0x59   : > { %p4956_p10 = pnand %p4955_p5, %p4949_p1 }
  0x5b   : > { %4959 = shalt.err (!%p4956_p10)
}
  0x5c   : > { %4620 = dma.hbm_to_vmem [thread:$0]  (!%p5192_p12), %s5593_s6, 8192, %s352_s22, [#allocation8], %s5067_s24, %s5067_s24, %s5068_s26  }
  0x5d   : > { %p5621_p2 = scmp.ne.s32.totalorder %s5618_s29, 0 }
  0x5e   : > { %p5622_p0 = scmp.eq.s32.totalorder (!%p5621_p2), %s5154_s21, 0 }
  0x5f   : > { %392 = sbr.rel (%p5621_p2) target bundleno = 1364 (0x554), region = 60 }
  0x66   : > { %5033 = dma.done.wait (%p5622_p0), [#allocation5], 8192   ;;  %p5623_p3 = pmov %p5622_p0 }
  0x67   : > { %p5624_p5 = pmov %p5622_p0 }
  0x68   : > { %5035 = vsyncadd (%p5623_p3), [#allocation5], 4294959104 }
  0x69   : > { %5037 = dma.done.wait (%p5624_p5), [#allocation8], 16384   ;;  %p5625_p10 = pmov %p5622_p0 }
  0x6a   : > { %v5069_v0 = vmov 0.0   ;;  %vm5070_vm0 = vmmov 0   ;;  %v4674_v1 = vld [vmem:[#allocation4 + $0x40] sm:$0xff]   ;;  %v4676_v3 = vld [vmem:[#allocation4 + $0x48] sm:$0xff]   ;;  %v4678_v5 = vld [vmem:[#allocation4 + $0x50] sm:$0xff]   ;;  %p448_p12 = scmp.lt.s32.totalorder %s5154_s21, 1 }
  0x6b   : > { %5039 = vsyncadd (%p5625_p10), [#allocation8], 4294950912  ;;  %4094 = vmatprep.subr.bf16.mxu0 %v5069_v0  ;;  %459 = vst [vmem:[#allocation2] sm:$0xff] %v5069_v0  ;;  %4114 = vmatprep.subr.bf16.mxu1 %v5069_v0  ;;  %v4675_v2 = vld [vmem:[#allocation4] sm:$0xff]   ;;  %v4677_v4 = vld [vmem:[#allocation4 + $0x8] sm:$0xff]   ;;  %vm949_vm2 = vcmask 1046528  }
  0x6c   : > { %460 = vst [vmem:[#allocation2 + $0x8] sm:$0xff] %v5069_v0  ;;  %461 = vst [vmem:[#allocation2 + $0x10] sm:$0xff] %v5069_v0  ;;  %4110 = vmatprep.mubr.msk.bf16.mxu0 %vm5070_vm0, %v5069_v0  ;;  %4130 = vmatprep.mubr.msk.bf16.mxu1 %vm5070_vm0, %v5069_v0  ;;  %v4679_v6 = vld [vmem:[#allocation4 + $0x10] sm:$0xff]   ;;  %v4680_v7 = vld [vmem:[#allocation4 + $0x58] sm:$0xff]   ;;  %s449_s23 = scalar_select %p448_p12, %s5154_s21, 1  ;;  %vm3360_vm4 = vcmask 1041408  }
  0x6d   : > { %462 = vst [vmem:[#allocation3] sm:$0xff] %v5069_v0  ;;  %463 = vst [vmem:[#allocation3 + $0x8] sm:$0xff] %v5069_v0  ;;  %4095 = vmatpush3.bf16.msra.mxu0 %v4674_v1  ;;  %4115 = vmatpush3.bf16.msra.mxu1 %v4675_v2  ;;  %v4681_v8 = vld [vmem:[#allocation4 + $0x18] sm:$0xff]   ;;  %v4682_v9 = vld [vmem:[#allocation4 + $0x60] sm:$0xff]   ;;  %vm703_vm1 = vsmask.f32 7424 }
  0x6e   : > { %464 = vst [vmem:[#allocation3 + $0x10] sm:$0xff] %v5069_v0  ;;  %465 = vst [vmem:[#allocation3 + $0x18] sm:$0xff] %v5069_v0  ;;  %4096 = vmatprep.subr.bf16.mxu0 %v5069_v0  ;;  %4116 = vmatprep.subr.bf16.mxu1 %v5069_v0  ;;  %v4683_v10 = vld [vmem:[#allocation4 + $0x20] sm:$0xff]   ;;  %s4594_s29 = smul.u32 24, %s449_s23  ;;  %v4684_v11 = vld [vmem:[#allocation4 + $0x68] sm:$0xff]   ;;  %s5506_s19 = sand.u32 1, %s5054_s18  }
  0x6f   : > { %v4685_v12 = vld [vmem:[#allocation4 + $0x28] sm:$0xff]   ;;  %v4686_v13 = vld [vmem:[#allocation4 + $0x70] sm:$0xff]   ;;  %v4688_v15 = vld [vmem:[#allocation4 + $0x78] sm:$0xff]   ;;  %vm1176_vm3 = vsmask.f32 6400  ;;  %s447_s12 = scalar_lea.vmem [#allocation11], %s5506_s19 }
  0x70   : > { %s5318_s24 = scalar_lea.vmem %s5588_s1, %s4594_s29  ;;  %v4687_v14 = vld [vmem:[#allocation4 + $0x30] sm:$0xff]   ;;  %s5324_s20 = scalar_lea.vmem %s5587_s0, %s4594_s29  ;;  %v4689_v17 = vld [vmem:[#allocation4 + $0x38] sm:$0xff]   ;;  %v4690_v23 = vld [vmem:[#allocation4 + $0x80] sm:$0xff]  }
  0x71   : > { %4097 = vmatpush3.bf16.msra.mxu0 %v4676_v3  ;;  %4117 = vmatpush3.bf16.msra.mxu1 %v4677_v4  ;;  %v469_v16 = vld [vmem:[%s5318_s24] sm:$0xff]  ;;  %v470_v18 = vld [vmem:[%s5318_s24 + $0x8] sm:$0xff]  ;;  %v4691_v24 = vld [vmem:[#allocation4 + $0xc0] sm:$0xff]   ;;  %s3849_s15 = sshll.u32 %s5154_s21, 4  ;;  %s3508_s13 = sshll.u32 %s447_s12, 4  ;;  %s3509_s13 = int_to_ptr.vmem [resolvable:$true] %s3508_s13 }
  0x72   : > { %4098 = vmatprep.subr.bf16.mxu0 %v5069_v0  ;;  %4118 = vmatprep.subr.bf16.mxu1 %v5069_v0  ;;  %v466_v19 = vld [vmem:[%s5324_s20] sm:$0xff]  ;;  %v467_v20 = vld [vmem:[%s5324_s20 + $0x8] sm:$0xff]  ;;  %v5333_v21 = vpack.c.bf16 %v470_v18, %v469_v16  ;;  %v4696_v29 = vld [vmem:[#allocation4 + $0x98] sm:$0xff]   ;;  %s5515_s29 = scalar_lea.hbm %s5598_s11, %s3849_s15  ;;  %s3483_s22 = scalar_lea.sflag [#allocation12], %s5506_s19 }
  0x73   : > { %v5335_v22 = vpack.c.bf16 %v467_v20, %v466_v19  ;;  %v4692_v25 = vld [vmem:[#allocation4 + $0x88] sm:$0xff]   ;;  %v4694_v27 = vld [vmem:[#allocation4 + $0x90] sm:$0xff]   ;;  %v4697_v30 = vld [vmem:[#allocation4 + $0xd8] sm:$0xff]   ;;  %p5626_p7 = scmp.ne.s32.totalorder %s5615_s27, 0  ;;  %s5071_s26 = smov [#allocation11]  }
  0x74   : > { %v4693_v26 = vld [vmem:[#allocation4 + $0xc8] sm:$0xff]   ;;  %v4695_v28 = vld [vmem:[#allocation4 + $0xd0] sm:$0xff]   ;;  %v471_v31 = vld [vmem:[%s5318_s24 + $0x10] sm:$0xf]  ;;  %v829_v40 = vshll.u32 %v5333_v21, 16  ;;  %v827_v44 = vshrl.u32 %v5333_v21, 16 }
  0x75   : > { %4099 = vmatpush3.bf16.msra.mxu0 %v4678_v5  ;;  %4119 = vmatpush3.bf16.msra.mxu1 %v4679_v6  ;;  %v468_v32 = vld [vmem:[%s5324_s20 + $0x10] sm:$0xf]  ;;  %v4698_v33 = vld [vmem:[#allocation4 + $0xa0] sm:$0xff]   ;;  %v5354_v35 = vpack.c.bf16 %v471_v31, %v471_v31  ;;  %v4700_v37 = vld [vmem:[#allocation4 + $0xa8] sm:$0xff]   ;;  %v707_v38 = vshll.u32 %v5335_v22, 16  ;;  %v705_v43 = vshrl.u32 %v5335_v22, 16 }
  0x76   : > { %4100 = vmatprep.subr.bf16.mxu0 %v5069_v0  ;;  %4120 = vmatprep.subr.bf16.mxu1 %v5069_v0  ;;  %v4699_v34 = vld [vmem:[#allocation4 + $0xe0] sm:$0xff]   ;;  %v5356_v36 = vpack.c.bf16 %v468_v32, %v468_v32  ;;  %v4701_v39 = vld [vmem:[#allocation4 + $0xe8] sm:$0xff]   ;;  %v4702_v45 = vld [vmem:[#allocation4 + $0xb0] sm:$0xff]   ;;  %v831_v48 = vrot.slane %v829_v40, 1  ;;  %v950_v51 = vrot.slane %v5335_v22, 1  ;;  %v1064_v55 = vrot.slane %v5333_v21, 1 }
  0x77   : > { %v834_v42 = vshll.u32 %v5354_v35, 16  ;;  %v709_v46 = vrot.slane %v707_v38, 1  ;;  %v4703_v47 = vld [vmem:[#allocation4 + $0xf0] sm:$0xff]   ;;  %v4704_v53 = vld [vmem:[#allocation4 + $0xb8] sm:$0xff]   ;;  %v1065_v59 = vrot.slane %v5354_v35, 1  ;;  %v5376_v60 = vrot.slane %v705_v43, 1 }
  0x78   : > { %v712_v41 = vshll.u32 %v5356_v36, 16  ;;  %v951_v52 = vrot.slane %v5356_v36, 1  ;;  %v4705_v56 = vld [vmem:[#allocation4 + $0xf8] sm:$0xff]   ;;  %v832_v57 = vor.u32 %v831_v48, %v827_v44  ;;  %v1180_v58 = vshrl.u32 %v5356_v36, 16  ;;  %v4706_v61 = vld [vmem:[#allocation4 + $0x100] sm:$0xff]   ;;  %v4708_v6 = vld [vmem:[#allocation4 + $0x108] sm:$0xff]  }
  0x79   : > { %4101 = vmatpush3.bf16.msra.mxu0 %v4680_v7  ;;  %4121 = vmatpush3.bf16.msra.mxu1 %v4681_v8  ;;  %v836_v50 = vrot.slane %v834_v42, 1  ;;  %v710_v54 = vor.u32 %v709_v46, %v705_v43  ;;  %v1298_v62 = vshrl.u32 %v5354_v35, 16  ;;  %v4707_v1 = vld [vmem:[#allocation4 + $0x140] sm:$0xff]   ;;  %v5380_v2 = vrot.slane %v707_v38, 2  ;;  %v4716_v18 = vld [vmem:[#allocation4 + $0x128] sm:$0xff]   ;;  %v4718_v20 = vld [vmem:[#allocation4 + $0x130] sm:$0xff]  }
  0x7a   : > { %4102 = vmatprep.subr.bf16.mxu0 %v5069_v0  ;;  %4122 = vmatprep.subr.bf16.mxu1 %v5069_v0  ;;  %v714_v49 = vrot.slane %v712_v41, 1  ;;  %v5384_v4 = vrot.slane %v1180_v58, 1  ;;  %v5386_v5 = vrot.slane %v712_v41, 2  ;;  %v5389_v7 = vrot.slane %v827_v44, 1  ;;  %v4714_v16 = vld [vmem:[#allocation4 + $0x120] sm:$0xff]   ;;  %v4717_v19 = vld [vmem:[#allocation4 + $0x168] sm:$0xff]  }
  0x7b   : > { %v837_v3 = vsel %vm703_vm1, %v832_v57, %v836_v50  ;;  %v5391_v8 = vrot.slane %v829_v40, 2  ;;  %v4725_v31 = vld [vmem:[#allocation4 + $0x1c8] sm:$0xff]   ;;  %v4728_v32 = vld [vmem:[#allocation4 + $0x198] sm:$0xff]   ;;  %v4731_v35 = vld [vmem:[#allocation4 + $0x1e0] sm:$0xff]   ;;  %s4960_s24 = scalar_lea.vmem %s3509_s13, 16  ;;  %s4964_s17 = sshll.u32 %s5071_s26, 4  ;;  %s4965_s17 = int_to_ptr.vmem [resolvable:$false] %s4964_s17 }
  0x7c   : > { %v715_v63 = vsel %vm703_vm1, %v710_v54, %v714_v49  ;;  %v4732_v36 = vld [vmem:[#allocation4 + $0x1a8] sm:$0xff]   ;;  %v4735_v40 = vld [vmem:[#allocation4 + $0x1f0] sm:$0xff]   ;;  %v4736_v41 = vld [vmem:[#allocation4 + $0x1b8] sm:$0xff]   ;;  %v1184_v43 = vor.u32 %v5386_v5, %v5384_v4  ;;  %p4961_p4 = scmp.ne.s32.totalorder %s3509_s13, %s4960_s24  ;;  %s4966_s20 = scalar_lea.vmem %s4965_s17, 32 }
  0x7d   : > { %4103 = vmatpush3.bf16.msra.mxu0 %v4682_v9  ;;  %4123 = vmatpush3.bf16.msra.mxu1 %v4683_v10  ;;  %v4709_v9 = vld [vmem:[#allocation4 + $0x148] sm:$0xff]   ;;  %v5393_v10 = vrot.slane %v1298_v62, 1  ;;  %v1297_v44 = vor.u32 %v5391_v8, %v5389_v7  ;;  %v4738_v48 = vld [vmem:[#allocation7 + $0x40] sm:$0xff]   ;;  %v4744_v54 = vld [vmem:[#allocation7 + $0x58] sm:$0xff]   ;;  %p4967_p13 = scmp.lt.s32.totalorder %s3509_s13, %s4965_s17  ;;  %p4968_p1 = scmp.lt.s32.totalorder %s4966_s20, %s4960_s24 }
  0x7e   : > { %4104 = vmatprep.subr.bf16.mxu0 %v5069_v0  ;;  %4124 = vmatprep.subr.bf16.mxu1 %v5069_v0  ;;  %v4874_v38 = vld [vmem:[#allocation2] sm:$0xff]  ;;  %v4739_v49 = vld [vmem:[#allocation7] sm:$0xff]   ;;  %v4752_v62 = vld [vmem:[#allocation7 + $0x78] sm:$0xff]   ;;  %p4962_p8 = pnand %p4961_p4, %p5626_p7 }
  0x7f   : > { %v4740_v50 = vld [vmem:[#allocation7 + $0x48] sm:$0xff]   ;;  %v4747_v57 = vld [vmem:[#allocation7 + $0x20] sm:$0xff]   ;;  %p4969_p6 = por %p4968_p1, %p4967_p13 }
  0x80   : > { %v4748_v58 = vld [vmem:[#allocation7 + $0x68] sm:$0xff]   ;;  %p4963_p11 = pneg %p4962_p8 }
  0x81   : > { %4105 = vmatpush3.bf16.msra.mxu0 %v4684_v11  ;;  %4125 = vmatpush3.bf16.msra.mxu1 %v4685_v12  ;;  %v5395_v11 = vrot.slane %v834_v42, 2  ;;  %v4710_v12 = vld [vmem:[#allocation4 + $0x110] sm:$0xff]   ;;  %v4737_v42 = vld [vmem:[#allocation4 + $0x1f8] sm:$0xff]  }
  0x82   : > { %4106 = vmatprep.subr.bf16.mxu0 %v5069_v0  ;;  %4126 = vmatprep.subr.bf16.mxu1 %v5069_v0  ;;  %p4970_p9 = pnand %p4969_p6, %p4963_p11 }
  0x85   : > { %4107 = vmatpush3.bf16.msra.mxu0 %v4686_v13  ;;  %4127 = vmatpush3.bf16.msra.mxu1 %v4687_v14  ;;  %v4711_v13 = vld [vmem:[#allocation4 + $0x150] sm:$0xff]   ;;  %v4712_v14 = vld [vmem:[#allocation4 + $0x118] sm:$0xff]  }
  0x86   : > { %4108 = vmatprep.subr.bf16.mxu0 %v5069_v0  ;;  %4128 = vmatprep.subr.bf16.mxu1 %v5069_v0 }
  0x89   : > { %4109 = vmatpush3.bf16.msra.mxu0 %v4688_v15  ;;  %4129 = vmatpush3.bf16.msra.mxu1 %v4689_v17  ;;  %v4713_v15 = vld [vmem:[#allocation4 + $0x158] sm:$0xff]   ;;  %v4715_v17 = vld [vmem:[#allocation4 + $0x160] sm:$0xff]  }
  0x8a   : > { %4134 = vmatprep.subr.bf16.mxu0 %v5069_v0  ;;  %4154 = vmatprep.subr.bf16.mxu1 %v5069_v0 }
  0x8c   : > { %4111 = vmatmul.mubr.bf16.vlgmr.msra.gmra.mrb[0].mxu0 %v5333_v21  ;;  %4131 = vmatmul.mubr.bf16.vlgmr.msra.gmra.mrb[0].mxu1 %v5335_v22  ;;  %v4726_v22 = vld [vmem:[#allocation4 + $0x190] sm:$0xff]  }
  0x8d   : > { %4135 = vmatpush3.bf16.msra.mxu0 %v4690_v23  ;;  %4155 = vmatpush3.bf16.msra.mxu1 %v4691_v24  ;;  %v4719_v23 = vld [vmem:[#allocation4 + $0x170] sm:$0xff]   ;;  %v4720_v24 = vld [vmem:[#allocation4 + $0x138] sm:$0xff]  }
  0x8e   : > { %4136 = vmatprep.subr.bf16.mxu0 %v5069_v0  ;;  %4156 = vmatprep.subr.bf16.mxu1 %v5069_v0  ;;  %v4727_v21 = vld [vmem:[#allocation4 + $0x1d0] sm:$0xff]  }
  0x8f   : > { %4150 = vmatprep.mubr.msk.bf16.mxu0 %vm5070_vm0, %v5069_v0  ;;  %4170 = vmatprep.mubr.msk.bf16.mxu1 %vm5070_vm0, %v5069_v0 }
  0x91   : > { %4137 = vmatpush3.bf16.msra.mxu0 %v4692_v25  ;;  %4157 = vmatpush3.bf16.msra.mxu1 %v4693_v26  ;;  %v4721_v25 = vld [vmem:[#allocation4 + $0x178] sm:$0xff]   ;;  %v4722_v26 = vld [vmem:[#allocation4 + $0x180] sm:$0xff]  }
  0x92   : > { %4138 = vmatprep.subr.bf16.mxu0 %v5069_v0  ;;  %4158 = vmatprep.subr.bf16.mxu1 %v5069_v0 }
  0x95   : > { %4139 = vmatpush3.bf16.msra.mxu0 %v4694_v27  ;;  %4159 = vmatpush3.bf16.msra.mxu1 %v4695_v28  ;;  %v4723_v27 = vld [vmem:[#allocation4 + $0x1c0] sm:$0xff]   ;;  %v952_v28 = vsel %vm949_vm2, %v950_v51, %v951_v52  ;;  %v4741_v51 = vld [vmem:[#allocation7 + $0x8] sm:$0xff]   ;;  %v4742_v52 = vld [vmem:[#allocation7 + $0x50] sm:$0xff]  }
  0x96   : > { %4140 = vmatprep.subr.bf16.mxu0 %v5069_v0  ;;  %4160 = vmatprep.subr.bf16.mxu1 %v5069_v0 }
  0x99   : > { %4141 = vmatpush3.bf16.msra.mxu0 %v4696_v29  ;;  %4161 = vmatpush3.bf16.msra.mxu1 %v4697_v30  ;;  %v1066_v29 = vsel %vm949_vm2, %v1064_v55, %v1065_v59  ;;  %v4724_v30 = vld [vmem:[#allocation4 + $0x188] sm:$0xff]   ;;  %v4745_v55 = vld [vmem:[#allocation7 + $0x18] sm:$0xff]  }
  0x9a   : > { %4142 = vmatprep.subr.bf16.mxu0 %v5069_v0  ;;  %4162 = vmatprep.subr.bf16.mxu1 %v5069_v0  ;;  %v4749_v59 = vld [vmem:[#allocation7 + $0x28] sm:$0xff]  }
  0x9d   : > { %4143 = vmatpush3.bf16.msra.mxu0 %v4698_v33  ;;  %4163 = vmatpush3.bf16.msra.mxu1 %v4699_v34  ;;  %v4729_v33 = vld [vmem:[#allocation4 + $0x1d8] sm:$0xff]   ;;  %v4730_v34 = vld [vmem:[#allocation4 + $0x1a0] sm:$0xff]  }
  0x9e   : > { %4144 = vmatprep.subr.bf16.mxu0 %v5069_v0  ;;  %4164 = vmatprep.subr.bf16.mxu1 %v5069_v0 }
  0xa1   : > { %4145 = vmatpush3.bf16.msra.mxu0 %v4700_v37  ;;  %4165 = vmatpush3.bf16.msra.mxu1 %v4701_v39  ;;  %v4733_v37 = vld [vmem:[#allocation4 + $0x1e8] sm:$0xff]   ;;  %v4734_v39 = vld [vmem:[#allocation4 + $0x1b0] sm:$0xff]  }
  0xa2   : > { %4146 = vmatprep.subr.bf16.mxu0 %v5069_v0  ;;  %4166 = vmatprep.subr.bf16.mxu1 %v5069_v0 }
  0xa5   : > { %4147 = vmatpush3.bf16.msra.mxu0 %v4702_v45  ;;  %4167 = vmatpush3.bf16.msra.mxu1 %v4703_v47  ;;  %v1302_v45 = vor.u32 %v5395_v11, %v5393_v10 }
  0xa6   : > { %4148 = vmatprep.subr.bf16.mxu0 %v5069_v0  ;;  %4168 = vmatprep.subr.bf16.mxu1 %v5069_v0 }
  0xa7   : > { %v1303_v47 = vsel %vm1176_vm3, %v1297_v44, %v1302_v45 }
  0xa9   : > { %4149 = vmatpush3.bf16.msra.mxu0 %v4704_v53  ;;  %4169 = vmatpush3.bf16.msra.mxu1 %v4705_v56  ;;  %v4743_v53 = vld [vmem:[#allocation7 + $0x10] sm:$0xff]   ;;  %v4746_v56 = vld [vmem:[#allocation7 + $0x60] sm:$0xff]  }
  0xaa   : > { %4174 = vmatprep.subr.bf16.mxu0 %v5069_v0  ;;  %4194 = vmatprep.subr.bf16.mxu1 %v5069_v0 }
  0xac   : > { %4151 = vmatmul.mubr.bf16.vlgmr.msra.gmra.mrb[4].mxu0 %v715_v63  ;;  %4171 = vmatmul.mubr.bf16.vlgmr.msra.gmra.mrb[4].mxu1 %v837_v3  ;;  %v4753_v63 = vld [vmem:[#allocation7 + $0x38] sm:$0xff]  }
  0xad   : > { %4175 = vmatpush3.bf16.msra.mxu0 %v4706_v61  ;;  %4195 = vmatpush3.bf16.msra.mxu1 %v4707_v1  ;;  %v4751_v61 = vld [vmem:[#allocation7 + $0x30] sm:$0xff]   ;;  %v5449_v1 = vld [vmem:[#allocation7 + $0x80] sm:$0xff]  }
  0xae   : > { %4176 = vmatprep.subr.bf16.mxu0 %v5069_v0  ;;  %4196 = vmatprep.subr.bf16.mxu1 %v5069_v0 }
  0xaf   : > { %4190 = vmatprep.mubr.msk.bf16.mxu0 %vm5070_vm0, %v5069_v0  ;;  %4210 = vmatprep.mubr.msk.bf16.mxu1 %vm5070_vm0, %v5069_v0 }
  0xb1   : > { %4177 = vmatpush3.bf16.msra.mxu0 %v4708_v6  ;;  %4197 = vmatpush3.bf16.msra.mxu1 %v4709_v9 }
  0xb2   : > { %4178 = vmatprep.subr.bf16.mxu0 %v5069_v0  ;;  %4198 = vmatprep.subr.bf16.mxu1 %v5069_v0 }
  0xb5   : > { %4179 = vmatpush3.bf16.msra.mxu0 %v4710_v12  ;;  %4199 = vmatpush3.bf16.msra.mxu1 %v4711_v13 }
  0xb6   : > { %4180 = vmatprep.subr.bf16.mxu0 %v5069_v0  ;;  %4200 = vmatprep.subr.bf16.mxu1 %v5069_v0 }
  0xb9   : > { %4181 = vmatpush3.bf16.msra.mxu0 %v4712_v14  ;;  %4201 = vmatpush3.bf16.msra.mxu1 %v4713_v15 }
  0xba   : > { %4182 = vmatprep.subr.bf16.mxu0 %v5069_v0  ;;  %4202 = vmatprep.subr.bf16.mxu1 %v5069_v0 }
  0xbd   : > { %4183 = vmatpush3.bf16.msra.mxu0 %v4714_v16  ;;  %4203 = vmatpush3.bf16.msra.mxu1 %v4715_v17 }
  0xbe   : > { %4184 = vmatprep.subr.bf16.mxu0 %v5069_v0  ;;  %4204 = vmatprep.subr.bf16.mxu1 %v5069_v0 }
  0xc1   : > { %4185 = vmatpush3.bf16.msra.mxu0 %v4716_v18  ;;  %4205 = vmatpush3.bf16.msra.mxu1 %v4717_v19 }
  0xc2   : > { %4186 = vmatprep.subr.bf16.mxu0 %v5069_v0  ;;  %4206 = vmatprep.subr.bf16.mxu1 %v5069_v0 }
  0xc5   : > { %4187 = vmatpush3.bf16.msra.mxu0 %v4718_v20  ;;  %4207 = vmatpush3.bf16.msra.mxu1 %v4719_v23 }
  0xc6   : > { %4188 = vmatprep.subr.bf16.mxu0 %v5069_v0  ;;  %4208 = vmatprep.subr.bf16.mxu1 %v5069_v0 }
  0xc9   : > { %4189 = vmatpush3.bf16.msra.mxu0 %v4720_v24  ;;  %4209 = vmatpush3.bf16.msra.mxu1 %v4721_v25 }
  0xca   : > { %4214 = vmatprep.subr.bf16.mxu0 %v5069_v0  ;;  %4234 = vmatprep.subr.bf16.mxu1 %v5069_v0 }
  0xcc   : > { %4191 = vmatmul.mubr.bf16.vlgmr.msra.gmra.mrb[8].mxu0 %v952_v28  ;;  %4211 = vmatmul.mubr.bf16.vlgmr.msra.gmra.mrb[8].mxu1 %v1066_v29 }
  0xcd   : > { %4215 = vmatpush3.bf16.msra.mxu0 %v4722_v26  ;;  %4235 = vmatpush3.bf16.msra.mxu1 %v4723_v27 }
  0xce   : > { %4216 = vmatprep.subr.bf16.mxu0 %v5069_v0  ;;  %4236 = vmatprep.subr.bf16.mxu1 %v5069_v0 }
  0xcf   : > { %4230 = vmatprep.mubr.msk.bf16.mxu0 %vm5070_vm0, %v5069_v0  ;;  %4250 = vmatprep.mubr.msk.bf16.mxu1 %vm5070_vm0, %v5069_v0 }
  0xd1   : > { %4217 = vmatpush3.bf16.msra.mxu0 %v4724_v30  ;;  %4237 = vmatpush3.bf16.msra.mxu1 %v4725_v31 }
  0xd2   : > { %4218 = vmatprep.subr.bf16.mxu0 %v5069_v0  ;;  %4238 = vmatprep.subr.bf16.mxu1 %v5069_v0 }
  0xd5   : > { %4219 = vmatpush3.bf16.msra.mxu0 %v4726_v22  ;;  %4239 = vmatpush3.bf16.msra.mxu1 %v4727_v21 }
  0xd6   : > { %4220 = vmatprep.subr.bf16.mxu0 %v5069_v0  ;;  %4240 = vmatprep.subr.bf16.mxu1 %v5069_v0 }
  0xd9   : > { %4221 = vmatpush3.bf16.msra.mxu0 %v4728_v32  ;;  %4241 = vmatpush3.bf16.msra.mxu1 %v4729_v33 }
  0xda   : > { %4222 = vmatprep.subr.bf16.mxu0 %v5069_v0  ;;  %4242 = vmatprep.subr.bf16.mxu1 %v5069_v0  ;;  %v1179_v0 = vor.u32 %v5380_v2, %v5376_v60  ;;  %v4750_v60 = vld [vmem:[#allocation7 + $0x70] sm:$0xff]   ;;  %v5451_v2 = vld [vmem:[#allocation7 + $0xc0] sm:$0xff]  }
  0xdc   : > { %v1185_v46 = vsel %vm1176_vm3, %v1179_v0, %v1184_v43 }
  0xdd   : > { %4223 = vmatpush3.bf16.msra.mxu0 %v4730_v34  ;;  %4243 = vmatpush3.bf16.msra.mxu1 %v4731_v35 }
  0xde   : > { %4224 = vmatprep.subr.bf16.mxu0 %v4874_v38  ;;  %4244 = vmatprep.subr.bf16.mxu1 %v4874_v38 }
  0xe1   : > { %4225 = vmatpush3.bf16.msra.mxu0 %v4732_v36  ;;  %4245 = vmatpush3.bf16.msra.mxu1 %v4733_v37 }
  0xe2   : > { %4226 = vmatprep.subr.bf16.mxu0 %v4874_v38  ;;  %4246 = vmatprep.subr.bf16.mxu1 %v4874_v38 }
  0xe5   : > { %4227 = vmatpush3.bf16.msra.mxu0 %v4734_v39  ;;  %4247 = vmatpush3.bf16.msra.mxu1 %v4735_v40 }
  0xe6   : > { %4228 = vmatprep.subr.bf16.mxu0 %v4874_v38  ;;  %4248 = vmatprep.subr.bf16.mxu1 %v4874_v38 }
  0xe9   : > { %4229 = vmatpush3.bf16.msra.mxu0 %v4736_v41  ;;  %4249 = vmatpush3.bf16.msra.mxu1 %v4737_v42  ;;  %v3710_v41 = vld [vmem:[%s5590_s3] ss:$0 sm:$0xff] }
  0xea   : > { %4254 = vmatprep.subr.bf16.mxu0 %v4738_v48  ;;  %4274 = vmatprep.subr.bf16.mxu1 %v4739_v49 }
  0xec   : > { %4231 = vmatmul.mubr.bf16.vlgmr.msra.gmra.mrb[12].mxu0 %v1185_v46  ;;  %4251 = vmatmul.mubr.bf16.vlgmr.msra.gmra.mrb[12].mxu1 %v1303_v47 }
  0xed   : > { %4255 = vmatpush3.bf16.msra.mxu0 %v4738_v48  ;;  %4275 = vmatpush3.bf16.msra.mxu1 %v4739_v49 }
  0xee   : > { %4256 = vmatprep.subr.bf16.mxu0 %v4740_v50  ;;  %4276 = vmatprep.subr.bf16.mxu1 %v4741_v51 }
  0xf1   : > { %4257 = vmatpush3.bf16.msra.mxu0 %v4740_v50  ;;  %4277 = vmatpush3.bf16.msra.mxu1 %v4741_v51 }
  0xf2   : > { %4258 = vmatprep.subr.bf16.mxu0 %v4742_v52  ;;  %4278 = vmatprep.subr.bf16.mxu1 %v4743_v53 }
  0xf5   : > { %4259 = vmatpush3.bf16.msra.mxu0 %v4742_v52  ;;  %4279 = vmatpush3.bf16.msra.mxu1 %v4743_v53 }
  0xf6   : > { %4260 = vmatprep.subr.bf16.mxu0 %v4744_v54  ;;  %4280 = vmatprep.subr.bf16.mxu1 %v4745_v55 }
  0xf9   : > { %4261 = vmatpush3.bf16.msra.mxu0 %v4744_v54  ;;  %4281 = vmatpush3.bf16.msra.mxu1 %v4745_v55 }
  0xfa   : > { %4262 = vmatprep.subr.bf16.mxu0 %v4746_v56  ;;  %4282 = vmatprep.subr.bf16.mxu1 %v4747_v57 }
  0xfd   : > { %4263 = vmatpush3.bf16.msra.mxu0 %v4746_v56  ;;  %4283 = vmatpush3.bf16.msra.mxu1 %v4747_v57 }
  0xfe   : > { %4264 = vmatprep.subr.bf16.mxu0 %v4748_v58  ;;  %4284 = vmatprep.subr.bf16.mxu1 %v4749_v59 }
 0x101   : > { %4265 = vmatpush3.bf16.msra.mxu0 %v4748_v58  ;;  %4285 = vmatpush3.bf16.msra.mxu1 %v4749_v59 }
 0x102   : > { %4266 = vmatprep.subr.bf16.mxu0 %v4750_v60  ;;  %4286 = vmatprep.subr.bf16.mxu1 %v4751_v61 }
 0x105   : > { %4267 = vmatpush3.bf16.msra.mxu0 %v4750_v60  ;;  %4287 = vmatpush3.bf16.msra.mxu1 %v4751_v61 }
 0x106   : > { %4268 = vmatprep.subr.bf16.mxu0 %v4752_v62  ;;  %4288 = vmatprep.subr.bf16.mxu1 %v4753_v63 }
 0x109   : > { %4269 = vmatpush3.bf16.msra.mxu0 %v4752_v62  ;;  %4289 = vmatpush3.bf16.msra.mxu1 %v4753_v63 }
 0x10a   : > { %4294 = vmatprep.subr.bf16.mxu0 %v5449_v1  ;;  %4314 = vmatprep.subr.bf16.mxu1 %v5451_v2 }
 0x15f   : > { %v589_v3 = vpop.f32.mrb[0].mxu0  ;;  %v678_v4 = vpop.f32.mrb[0].mxu1 }
 0x160   : > { %v4112_v5 = vpop.f32.mrb[1].mxu0  ;;  %v679_v6 = vadd.f32 %v678_v4, %v589_v3  ;;  %v4132_v7 = vpop.f32.mrb[1].mxu1 }
 0x161   : > { %v592_v8 = vpop.f32.mrb[2].mxu0  ;;  %v681_v9 = vpop.f32.mrb[2].mxu1  ;;  %v4756_v5 = vld [vmem:[#allocation7 + $0x88] sm:$0xff]  }
 0x162   : > { %v4113_v10 = vpop.f32.mrb[3].mxu0  ;;  %v682_v11 = vadd.f32 %v681_v9, %v592_v8  ;;  %v4133_v12 = vpop.f32.mrb[3].mxu1  ;;  %v4757_v8 = vld [vmem:[#allocation7 + $0xc8] sm:$0xff]  }
 0x163   : > { %v4759_v12 = vld [vmem:[#allocation7 + $0xd0] sm:$0xff]  }
 0x17f   : > { %v799_v13 = vpop.f32.mrb[4].mxu0  ;;  %v921_v15 = vpop.f32.mrb[4].mxu1 }
 0x180   : > { %v806_v14 = vadd.f32 %v799_v13, %v679_v6  ;;  %v4152_v16 = vpop.f32.mrb[5].mxu0  ;;  %v4172_v17 = vpop.f32.mrb[5].mxu1  ;;  %v4760_v13 = vld [vmem:[#allocation7 + $0x98] sm:$0xff]  }
 0x181   : > { %v802_v18 = vpop.f32.mrb[6].mxu0  ;;  %v924_v23 = vpop.f32.mrb[6].mxu1  ;;  %v4765_v16 = vld [vmem:[#allocation7 + $0xe8] sm:$0xff]   ;;  %v4766_v17 = vld [vmem:[#allocation7 + $0xb0] sm:$0xff]  }
 0x182   : > { %v928_v19 = vadd.f32 %v921_v15, %v806_v14  ;;  %v807_v20 = vadd.f32 %v802_v18, %v682_v11  ;;  %v4153_v24 = vpop.f32.mrb[7].mxu0  ;;  %v4173_v25 = vpop.f32.mrb[7].mxu1  ;;  %v4758_v11 = vld [vmem:[#allocation7 + $0x90] sm:$0xff]   ;;  %v4761_v14 = vld [vmem:[#allocation7 + $0xd8] sm:$0xff]   ;;  %v4762_v15 = vld [vmem:[#allocation7 + $0xa0] sm:$0xff]  }
 0x183   : > { %v4767_v18 = vld [vmem:[#allocation7 + $0xf0] sm:$0xff]   ;;  %v4771_v24 = vld [vmem:[#allocation7 + $0x140] sm:$0xff]  }
 0x184   : > { %v929_v26 = vadd.f32 %v924_v23, %v807_v20  ;;  %v4769_v20 = vld [vmem:[#allocation7 + $0xf8] sm:$0xff]   ;;  %v4770_v23 = vld [vmem:[#allocation7 + $0x100] sm:$0xff]  }
 0x19f   : > { %v1036_v27 = vpop.f32.mrb[8].mxu0  ;;  %v1150_v29 = vpop.f32.mrb[8].mxu1 }
 0x1a0   : > { %v1043_v28 = vadd.f32 %v1036_v27, %v928_v19  ;;  %v4192_v30 = vpop.f32.mrb[9].mxu0  ;;  %v4212_v31 = vpop.f32.mrb[9].mxu1  ;;  %v4768_v19 = vld [vmem:[#allocation7 + $0xb8] sm:$0xff]  }
 0x1a1   : > { %v1039_v22 = vpop.f32.mrb[10].mxu0  ;;  %v1153_v33 = vpop.f32.mrb[10].mxu1  ;;  %v4772_v31 = vld [vmem:[#allocation7 + $0x108] sm:$0xff]  }
 0x1a2   : > { %v1157_v21 = vadd.f32 %v1150_v29, %v1043_v28  ;;  %v1044_v32 = vadd.f32 %v1039_v22, %v929_v26  ;;  %v4193_v34 = vpop.f32.mrb[11].mxu0  ;;  %v4213_v35 = vpop.f32.mrb[11].mxu1  ;;  %v4773_v22 = vld [vmem:[#allocation7 + $0x148] sm:$0xff]  }
 0x1a3   : > { %v4776_v34 = vld [vmem:[#allocation7 + $0x118] sm:$0xff]  }
 0x1a4   : > { %v1158_v36 = vadd.f32 %v1153_v33, %v1044_v32  ;;  %v4774_v32 = vld [vmem:[#allocation7 + $0x110] sm:$0xff]   ;;  %v4777_v35 = vld [vmem:[#allocation7 + $0x158] sm:$0xff]  }
 0x1a5   : > { %v4775_v33 = vld [vmem:[#allocation7 + $0x150] sm:$0xff]  }
 0x1bf   : > { %v1269_v37 = vpop.f32.mrb[12].mxu0  ;;  %v1387_v39 = vpop.f32.mrb[12].mxu1 }
 0x1c0   : > { %v1276_v38 = vadd.f32 %v1269_v37, %v1157_v21  ;;  %v4232_v40 = vpop.f32.mrb[13].mxu0  ;;  %v4252_v42 = vpop.f32.mrb[13].mxu1  ;;  %v4779_v37 = vld [vmem:[#allocation7 + $0x160] sm:$0xff]  }
 0x1c1   : > { %v1272_v0 = vpop.f32.mrb[14].mxu0  ;;  %v1390_v45 = vpop.f32.mrb[14].mxu1  ;;  %v4782_v40 = vld [vmem:[#allocation7 + $0x130] sm:$0xff]   ;;  %v4784_v42 = vld [vmem:[#allocation7 + $0x138] sm:$0xff]  }
 0x1c2   : > { %v1394_v43 = vadd.f32 %v1387_v39, %v1276_v38  ;;  %v1277_v44 = vadd.f32 %v1272_v0, %v1158_v36  ;;  %v4233_v46 = vpop.f32.mrb[15].mxu0  ;;  %v4253_v47 = vpop.f32.mrb[15].mxu1  ;;  %v4778_v36 = vld [vmem:[#allocation7 + $0x120] sm:$0xff]   ;;  %v4780_v38 = vld [vmem:[#allocation7 + $0x128] sm:$0xff]   ;;  %v4785_v0 = vld [vmem:[#allocation7 + $0x178] sm:$0xff]  }
 0x1c3   : > { %v4781_v39 = vld [vmem:[#allocation7 + $0x168] sm:$0xff]   ;;  %v4787_v46 = vld [vmem:[#allocation7 + $0x1c0] sm:$0xff]  }
 0x1c4   : > { %v1403_v48 = vadd.f32 %v3710_v41, %v1394_v43  ;;  %v1395_v49 = vadd.f32 %v1390_v45, %v1277_v44  ;;  %v1888_v43 = vld [vmem:[#allocation2 + $0x14] sm:$0x1]  ;;  %v2009_v44 = vld [vmem:[#allocation2 + $0x15] sm:$0x1]  ;;  %v4786_v45 = vld [vmem:[#allocation7 + $0x180] sm:$0xff]  }
 0x1c5   : > { %v1890_v47 = vpack.c.bf16 %v1888_v43, %v1888_v43 }
 0x1c6   : > { %v1405_v50 = vmax.f32 %v1403_v48, 0.0  ;;  %v1404_v51 = vadd.f32 %v3710_v41, %v1395_v49  ;;  %v4783_v41 = vld [vmem:[#allocation7 + $0x170] sm:$0xff]   ;;  %v2011_v48 = vpack.c.bf16 %v2009_v44, %v2009_v44 }
 0x1c8   : > { %1407 = vst [vmem:[#allocation2 + $0x4] sm:$0xff] %v1405_v50  ;;  %v1406_v52 = vmax.f32 %v1404_v51, 0.0 }
 0x1ca   : > { %1408 = vst [vmem:[#allocation2 + $0xc] sm:$0xff] %v1406_v52  ;;  %v5458_v53 = vpack.c.bf16 %v1406_v52, %v1405_v50 }
 0x1cf   : > { %v1430_v54 = vld [vmem:[#allocation2 + $0x1] sm:$0xff] }
 0x1d0   : > { %v1409_v55 = vld [vmem:[#allocation2] sm:$0xff] }
 0x1d1   : > { %v1431_v56 = vld [vmem:[#allocation2 + $0x9] sm:$0xff]  ;;  %v1432_v58 = vld [vmem:[#allocation2 + $0x11] sm:$0x1]  ;;  %v1646_v25 = vld [vmem:[#allocation2 + $0x12] sm:$0x1] }
 0x1d2   : > { %v1410_v57 = vld [vmem:[#allocation2 + $0x8] sm:$0xff]  ;;  %v1433_v59 = vpack.c.bf16 %v1431_v56, %v1430_v54  ;;  %v1434_v61 = vpack.c.bf16 %v1432_v58, %v1432_v58  ;;  %v1411_v62 = vld [vmem:[#allocation2 + $0x10] sm:$0x1]  ;;  %v1767_v26 = vld [vmem:[#allocation2 + $0x13] sm:$0x1]  ;;  %v1648_v29 = vpack.c.bf16 %v1646_v25, %v1646_v25 }
 0x1d3   : > { %v1412_v60 = vpack.c.bf16 %v1410_v57, %v1409_v55  ;;  %v1645_v63 = vld [vmem:[#allocation2 + $0xa] sm:$0xff]  ;;  %v1413_v4 = vpack.c.bf16 %v1411_v62, %v1411_v62  ;;  %v1644_v6 = vld [vmem:[#allocation2 + $0x2] sm:$0xff]  ;;  %v1769_v30 = vpack.c.bf16 %v1767_v26, %v1767_v26  ;;  %v4795_v62 = vld [vmem:[#allocation7 + $0x1e0] sm:$0xff]  }
 0x1d4   : > { %v1766_v3 = vld [vmem:[#allocation2 + $0xb] sm:$0xff]  ;;  %4270 = vmatprep.mubr.bf16.mxu0 %v1433_v59  ;;  %v1765_v7 = vld [vmem:[#allocation2 + $0x3] sm:$0xff]  ;;  %v1647_v9 = vpack.c.bf16 %v1645_v63, %v1644_v6 }
 0x1d5   : > { %4290 = vmatprep.mubr.bf16.mxu1 %v1412_v60  ;;  %4271 = vmatmul.mubr.bf16.vlgmr.msra.gmra.mrb[16].mxu0 %v1434_v61  ;;  %v1768_v10 = vpack.c.bf16 %v1766_v3, %v1765_v7  ;;  %v2007_v27 = vld [vmem:[#allocation2 + $0x5] sm:$0xff]  ;;  %v2008_v28 = vld [vmem:[#allocation2 + $0xd] sm:$0xff]  ;;  %v4794_v61 = vld [vmem:[#allocation7 + $0x1a0] sm:$0xff]  }
 0x1d6   : > { %4291 = vmatmul.mubr.bf16.vlgmr.msra.gmra.mrb[16].mxu1 %v1413_v4  ;;  %4295 = vmatpush3.bf16.msra.mxu0 %v5449_v1  ;;  %v4763_v1 = vld [vmem:[#allocation7 + $0xe0] sm:$0xff]   ;;  %v2010_v21 = vpack.c.bf16 %v2008_v28, %v2007_v27  ;;  %v2128_v49 = vld [vmem:[#allocation2 + $0x6] sm:$0xff]  ;;  %v2129_v50 = vld [vmem:[#allocation2 + $0xe] sm:$0xff] }
 0x1d7   : > { %4315 = vmatpush3.bf16.msra.mxu1 %v5451_v2  ;;  %4310 = vmatprep.mubr.bf16.mxu0 %v1647_v9  ;;  %v4764_v2 = vld [vmem:[#allocation7 + $0xa8] sm:$0xff]   ;;  %v2250_v52 = vld [vmem:[#allocation2 + $0xf] sm:$0xff]  ;;  %v2131_v54 = vpack.c.bf16 %v2129_v50, %v2128_v49  ;;  %v2251_v9 = vld [vmem:[#allocation2 + $0x17] sm:$0x1] }
 0x1d8   : > { %4330 = vmatprep.mubr.bf16.mxu1 %v1768_v10  ;;  %4296 = vmatprep.subr.bf16.mxu0 %v4756_v5  ;;  %v2249_v51 = vld [vmem:[#allocation2 + $0x7] sm:$0xff]  ;;  %v4792_v59 = vld [vmem:[#allocation7 + $0x198] sm:$0xff]   ;;  %v5463_v28 = vld [vmem:[#allocation9 + $0x80] sm:$0xff]  }
 0x1d9   : > { %4316 = vmatprep.subr.bf16.mxu1 %v4757_v8  ;;  %v4789_v55 = vld [vmem:[#allocation7 + $0x1c8] sm:$0xff]   ;;  %v2252_v56 = vpack.c.bf16 %v2250_v52, %v2249_v51  ;;  %v4790_v57 = vld [vmem:[#allocation7 + $0x190] sm:$0xff]   ;;  %v4793_v60 = vld [vmem:[#allocation7 + $0x1d8] sm:$0xff]  }
 0x1da   : > { %4297 = vmatpush3.bf16.msra.mxu0 %v4756_v5  ;;  %v4791_v58 = vld [vmem:[#allocation7 + $0x1d0] sm:$0xff]   ;;  %v4796_v63 = vld [vmem:[#allocation7 + $0x1a8] sm:$0xff]   ;;  %v4800_v6 = vld [vmem:[#allocation7 + $0x1b8] sm:$0xff]  }
 0x1db   : > { %4317 = vmatpush3.bf16.msra.mxu1 %v4757_v8  ;;  %4298 = vmatprep.subr.bf16.mxu0 %v4758_v11  ;;  %v4797_v3 = vld [vmem:[#allocation7 + $0x1e8] sm:$0xff]   ;;  %v4798_v4 = vld [vmem:[#allocation7 + $0x1b0] sm:$0xff]   ;;  %v4801_v7 = vld [vmem:[#allocation7 + $0x1f8] sm:$0xff]  }
 0x1dc   : > { %4318 = vmatprep.subr.bf16.mxu1 %v4759_v12  ;;  %v4799_v5 = vld [vmem:[#allocation7 + $0x1f0] sm:$0xff]   ;;  %v2130_v8 = vld [vmem:[#allocation2 + $0x16] sm:$0x1] }
 0x1dd   : > { %v2132_v10 = vpack.c.bf16 %v2130_v8, %v2130_v8  ;;  %v4815_v25 = vld [vmem:[#allocation9 + $0x30] sm:$0xff]   ;;  %v4816_v26 = vld [vmem:[#allocation9 + $0x78] sm:$0xff]  }
 0x1de   : > { %4299 = vmatpush3.bf16.msra.mxu0 %v4758_v11  ;;  %v2253_v11 = vpack.c.bf16 %v2251_v9, %v2251_v9  ;;  %v4817_v27 = vld [vmem:[#allocation9 + $0x38] sm:$0xff]   ;;  %v3775_v9 = vld [vmem:[%s5592_s5] ss:$0 sm:$0xff] }
 0x1df   : > { %4319 = vmatpush3.bf16.msra.mxu1 %v4759_v12  ;;  %4300 = vmatprep.subr.bf16.mxu0 %v4760_v13  ;;  %v4802_v12 = vld [vmem:[#allocation9 + $0x40] sm:$0xff]  }
 0x1e0   : > { %4320 = vmatprep.subr.bf16.mxu1 %v4761_v14 }
 0x1e2   : > { %4301 = vmatpush3.bf16.msra.mxu0 %v4760_v13  ;;  %v4803_v13 = vld [vmem:[#allocation9] sm:$0xff]  }
 0x1e3   : > { %4321 = vmatpush3.bf16.msra.mxu1 %v4761_v14  ;;  %4302 = vmatprep.subr.bf16.mxu0 %v4762_v15  ;;  %v4804_v14 = vld [vmem:[#allocation9 + $0x48] sm:$0xff]  }
 0x1e4   : > { %4322 = vmatprep.subr.bf16.mxu1 %v4763_v1 }
 0x1e6   : > { %4303 = vmatpush3.bf16.msra.mxu0 %v4762_v15  ;;  %v4805_v15 = vld [vmem:[#allocation9 + $0x8] sm:$0xff]  }
 0x1e7   : > { %4323 = vmatpush3.bf16.msra.mxu1 %v4763_v1  ;;  %4304 = vmatprep.subr.bf16.mxu0 %v4764_v2  ;;  %v4806_v1 = vld [vmem:[#allocation9 + $0x50] sm:$0xff]  }
 0x1e8   : > { %4324 = vmatprep.subr.bf16.mxu1 %v4765_v16 }
 0x1ea   : > { %4305 = vmatpush3.bf16.msra.mxu0 %v4764_v2  ;;  %v4807_v2 = vld [vmem:[#allocation9 + $0x10] sm:$0xff]  }
 0x1eb   : > { %4325 = vmatpush3.bf16.msra.mxu1 %v4765_v16  ;;  %4306 = vmatprep.subr.bf16.mxu0 %v4766_v17  ;;  %v4808_v16 = vld [vmem:[#allocation9 + $0x58] sm:$0xff]  }
 0x1ec   : > { %4326 = vmatprep.subr.bf16.mxu1 %v4767_v18 }
 0x1ee   : > { %4307 = vmatpush3.bf16.msra.mxu0 %v4766_v17  ;;  %v4809_v17 = vld [vmem:[#allocation9 + $0x18] sm:$0xff]  }
 0x1ef   : > { %4327 = vmatpush3.bf16.msra.mxu1 %v4767_v18  ;;  %4308 = vmatprep.subr.bf16.mxu0 %v4768_v19  ;;  %v4810_v18 = vld [vmem:[#allocation9 + $0x60] sm:$0xff]  }
 0x1f0   : > { %4328 = vmatprep.subr.bf16.mxu1 %v4769_v20 }
 0x1f2   : > { %4309 = vmatpush3.bf16.msra.mxu0 %v4768_v19  ;;  %v4811_v19 = vld [vmem:[#allocation9 + $0x20] sm:$0xff]  }
 0x1f3   : > { %4329 = vmatpush3.bf16.msra.mxu1 %v4769_v20  ;;  %4334 = vmatprep.subr.bf16.mxu0 %v4770_v23  ;;  %v4812_v20 = vld [vmem:[#allocation9 + $0x68] sm:$0xff]  }
 0x1f4   : > { %4354 = vmatprep.subr.bf16.mxu1 %v4771_v24 }
 0x1f5   : > { %4311 = vmatmul.mubr.bf16.vlgmr.msra.gmra.mrb[20].mxu0 %v1648_v29  ;;  %v5465_v29 = vld [vmem:[#allocation9 + $0xc0] sm:$0xff]  }
 0x1f6   : > { %4331 = vmatmul.mubr.bf16.vlgmr.msra.gmra.mrb[20].mxu1 %v1769_v30  ;;  %4335 = vmatpush3.bf16.msra.mxu0 %v4770_v23  ;;  %v4813_v23 = vld [vmem:[#allocation9 + $0x28] sm:$0xff]  }
 0x1f7   : > { %4350 = vmatprep.mubr.bf16.mxu0 %v5458_v53  ;;  %4355 = vmatpush3.bf16.msra.mxu1 %v4771_v24  ;;  %v4788_v53 = vld [vmem:[#allocation7 + $0x188] sm:$0xff]   ;;  %v4814_v24 = vld [vmem:[#allocation9 + $0x70] sm:$0xff]  }
 0x1f8   : > { %4370 = vmatprep.mubr.bf16.mxu1 %v2010_v21  ;;  %4336 = vmatprep.subr.bf16.mxu0 %v4772_v31 }
 0x1f9   : > { %4356 = vmatprep.subr.bf16.mxu1 %v4773_v22 }
 0x1fa   : > { %4337 = vmatpush3.bf16.msra.mxu0 %v4772_v31 }
 0x1fb   : > { %4357 = vmatpush3.bf16.msra.mxu1 %v4773_v22  ;;  %4338 = vmatprep.subr.bf16.mxu0 %v4774_v32 }
 0x1fc   : > { %4358 = vmatprep.subr.bf16.mxu1 %v4775_v33 }
 0x1fe   : > { %4339 = vmatpush3.bf16.msra.mxu0 %v4774_v32 }
 0x1ff   : > { %4359 = vmatpush3.bf16.msra.mxu1 %v4775_v33  ;;  %4340 = vmatprep.subr.bf16.mxu0 %v4776_v34 }
 0x200   : > { %4360 = vmatprep.subr.bf16.mxu1 %v4777_v35 }
 0x202   : > { %4341 = vmatpush3.bf16.msra.mxu0 %v4776_v34 }
 0x203   : > { %4361 = vmatpush3.bf16.msra.mxu1 %v4777_v35  ;;  %4342 = vmatprep.subr.bf16.mxu0 %v4778_v36 }
 0x204   : > { %4362 = vmatprep.subr.bf16.mxu1 %v4779_v37 }
 0x206   : > { %4343 = vmatpush3.bf16.msra.mxu0 %v4778_v36 }
 0x207   : > { %4363 = vmatpush3.bf16.msra.mxu1 %v4779_v37  ;;  %4344 = vmatprep.subr.bf16.mxu0 %v4780_v38 }
 0x208   : > { %4364 = vmatprep.subr.bf16.mxu1 %v4781_v39 }
 0x20a   : > { %4345 = vmatpush3.bf16.msra.mxu0 %v4780_v38 }
 0x20b   : > { %4365 = vmatpush3.bf16.msra.mxu1 %v4781_v39  ;;  %4346 = vmatprep.subr.bf16.mxu0 %v4782_v40 }
 0x20c   : > { %4366 = vmatprep.subr.bf16.mxu1 %v4783_v41 }
 0x20e   : > { %4347 = vmatpush3.bf16.msra.mxu0 %v4782_v40 }
 0x20f   : > { %4367 = vmatpush3.bf16.msra.mxu1 %v4783_v41  ;;  %4348 = vmatprep.subr.bf16.mxu0 %v4784_v42 }
 0x210   : > { %4368 = vmatprep.subr.bf16.mxu1 %v4785_v0 }
 0x212   : > { %4349 = vmatpush3.bf16.msra.mxu0 %v4784_v42 }
 0x213   : > { %4369 = vmatpush3.bf16.msra.mxu1 %v4785_v0  ;;  %4374 = vmatprep.subr.bf16.mxu0 %v4786_v45 }
 0x214   : > { %4394 = vmatprep.subr.bf16.mxu1 %v4787_v46 }
 0x215   : > { %4351 = vmatmul.mubr.bf16.vlgmr.msra.gmra.mrb[24].mxu0 %v1890_v47 }
 0x216   : > { %4371 = vmatmul.mubr.bf16.vlgmr.msra.gmra.mrb[24].mxu1 %v2011_v48  ;;  %4375 = vmatpush3.bf16.msra.mxu0 %v4786_v45 }
 0x217   : > { %4390 = vmatprep.mubr.bf16.mxu0 %v2131_v54  ;;  %4395 = vmatpush3.bf16.msra.mxu1 %v4787_v46 }
 0x218   : > { %4410 = vmatprep.mubr.bf16.mxu1 %v2252_v56  ;;  %4376 = vmatprep.subr.bf16.mxu0 %v4788_v53 }
 0x219   : > { %4396 = vmatprep.subr.bf16.mxu1 %v4789_v55 }
 0x21a   : > { %4377 = vmatpush3.bf16.msra.mxu0 %v4788_v53 }
 0x21b   : > { %4397 = vmatpush3.bf16.msra.mxu1 %v4789_v55  ;;  %4378 = vmatprep.subr.bf16.mxu0 %v4790_v57 }
 0x21c   : > { %4398 = vmatprep.subr.bf16.mxu1 %v4791_v58 }
 0x21e   : > { %4379 = vmatpush3.bf16.msra.mxu0 %v4790_v57 }
 0x21f   : > { %4399 = vmatpush3.bf16.msra.mxu1 %v4791_v58  ;;  %4380 = vmatprep.subr.bf16.mxu0 %v4792_v59 }
 0x220   : > { %4400 = vmatprep.subr.bf16.mxu1 %v4793_v60 }
 0x222   : > { %4381 = vmatpush3.bf16.msra.mxu0 %v4792_v59 }
 0x223   : > { %4401 = vmatpush3.bf16.msra.mxu1 %v4793_v60  ;;  %4382 = vmatprep.subr.bf16.mxu0 %v4794_v61 }
 0x224   : > { %4402 = vmatprep.subr.bf16.mxu1 %v4795_v62 }
 0x226   : > { %4383 = vmatpush3.bf16.msra.mxu0 %v4794_v61 }
 0x227   : > { %4403 = vmatpush3.bf16.msra.mxu1 %v4795_v62  ;;  %4384 = vmatprep.subr.bf16.mxu0 %v4796_v63 }
 0x228   : > { %4404 = vmatprep.subr.bf16.mxu1 %v4797_v3 }
 0x22a   : > { %4385 = vmatpush3.bf16.msra.mxu0 %v4796_v63 }
 0x22b   : > { %4405 = vmatpush3.bf16.msra.mxu1 %v4797_v3  ;;  %4386 = vmatprep.subr.bf16.mxu0 %v4798_v4 }
 0x22c   : > { %4406 = vmatprep.subr.bf16.mxu1 %v4799_v5 }
 0x22e   : > { %4387 = vmatpush3.bf16.msra.mxu0 %v4798_v4 }
 0x22f   : > { %4407 = vmatpush3.bf16.msra.mxu1 %v4799_v5  ;;  %4388 = vmatprep.subr.bf16.mxu0 %v4800_v6 }
 0x230   : > { %4408 = vmatprep.subr.bf16.mxu1 %v4801_v7 }
 0x232   : > { %4389 = vmatpush3.bf16.msra.mxu0 %v4800_v6 }
 0x233   : > { %4409 = vmatpush3.bf16.msra.mxu1 %v4801_v7  ;;  %4414 = vmatprep.subr.bf16.mxu0 %v4802_v12 }
 0x234   : > { %4434 = vmatprep.subr.bf16.mxu1 %v4803_v13 }
 0x235   : > { %4391 = vmatmul.mubr.bf16.vlgmr.msra.gmra.mrb[28].mxu0 %v2132_v10 }
 0x236   : > { %4411 = vmatmul.mubr.bf16.vlgmr.msra.gmra.mrb[28].mxu1 %v2253_v11  ;;  %4415 = vmatpush3.bf16.msra.mxu0 %v4802_v12 }
 0x237   : > { %4435 = vmatpush3.bf16.msra.mxu1 %v4803_v13  ;;  %4416 = vmatprep.subr.bf16.mxu0 %v4804_v14 }
 0x238   : > { %4436 = vmatprep.subr.bf16.mxu1 %v4805_v15 }
 0x23a   : > { %4417 = vmatpush3.bf16.msra.mxu0 %v4804_v14 }
 0x23b   : > { %4437 = vmatpush3.bf16.msra.mxu1 %v4805_v15  ;;  %4418 = vmatprep.subr.bf16.mxu0 %v4806_v1 }
 0x23c   : > { %4438 = vmatprep.subr.bf16.mxu1 %v4807_v2 }
 0x23e   : > { %4419 = vmatpush3.bf16.msra.mxu0 %v4806_v1 }
 0x23f   : > { %4439 = vmatpush3.bf16.msra.mxu1 %v4807_v2  ;;  %4420 = vmatprep.subr.bf16.mxu0 %v4808_v16 }
 0x240   : > { %4440 = vmatprep.subr.bf16.mxu1 %v4809_v17 }
 0x242   : > { %4421 = vmatpush3.bf16.msra.mxu0 %v4808_v16 }
 0x243   : > { %4441 = vmatpush3.bf16.msra.mxu1 %v4809_v17  ;;  %4422 = vmatprep.subr.bf16.mxu0 %v4810_v18 }
 0x244   : > { %4442 = vmatprep.subr.bf16.mxu1 %v4811_v19 }
 0x246   : > { %4423 = vmatpush3.bf16.msra.mxu0 %v4810_v18 }
 0x247   : > { %4443 = vmatpush3.bf16.msra.mxu1 %v4811_v19  ;;  %4424 = vmatprep.subr.bf16.mxu0 %v4812_v20 }
 0x248   : > { %4444 = vmatprep.subr.bf16.mxu1 %v4813_v23 }
 0x24a   : > { %4425 = vmatpush3.bf16.msra.mxu0 %v4812_v20 }
 0x24b   : > { %4445 = vmatpush3.bf16.msra.mxu1 %v4813_v23  ;;  %4426 = vmatprep.subr.bf16.mxu0 %v4814_v24 }
 0x24c   : > { %4446 = vmatprep.subr.bf16.mxu1 %v4815_v25 }
 0x24e   : > { %4427 = vmatpush3.bf16.msra.mxu0 %v4814_v24 }
 0x24f   : > { %4447 = vmatpush3.bf16.msra.mxu1 %v4815_v25  ;;  %4428 = vmatprep.subr.bf16.mxu0 %v4816_v26 }
 0x250   : > { %4448 = vmatprep.subr.bf16.mxu1 %v4817_v27 }
 0x252   : > { %4429 = vmatpush3.bf16.msra.mxu0 %v4816_v26 }
 0x253   : > { %4449 = vmatpush3.bf16.msra.mxu1 %v4817_v27  ;;  %4454 = vmatprep.subr.bf16.mxu0 %v5463_v28 }
 0x254   : > { %4474 = vmatprep.subr.bf16.mxu1 %v5465_v29 }
 0x2a8   : > { %v4272_v30 = vpop.f32.mrb[16].mxu0 }
 0x2a9   : > { %v4292_v31 = vpop.f32.mrb[16].mxu1  ;;  %v1534_v21 = vpop.f32.mrb[17].mxu0 }
 0x2aa   : > { %v1639_v22 = vadd.f32 %v4292_v31, %v4272_v30  ;;  %v1630_v32 = vpop.f32.mrb[17].mxu1  ;;  %v4273_v34 = vpop.f32.mrb[18].mxu0 }
 0x2ab   : > { %v1631_v33 = vadd.f32 %v1630_v32, %v1534_v21  ;;  %v4293_v35 = vpop.f32.mrb[18].mxu1  ;;  %v1537_v36 = vpop.f32.mrb[19].mxu0 }
 0x2ac   : > { %v1633_v37 = vpop.f32.mrb[19].mxu1 }
 0x2ad   : > { %v1634_v38 = vadd.f32 %v1633_v37, %v1537_v36 }
 0x2c8   : > { %v4312_v39 = vpop.f32.mrb[20].mxu0 }
 0x2c9   : > { %v4332_v40 = vpop.f32.mrb[20].mxu1  ;;  %v1764_v41 = vadd.f32 %v4312_v39, %v1639_v22  ;;  %v1748_v42 = vpop.f32.mrb[21].mxu0  ;;  %v4820_v39 = vld [vmem:[#allocation9 + $0x88] sm:$0xff]  }
 0x2ca   : > { %v1869_v0 = vpop.f32.mrb[21].mxu1  ;;  %v1762_v43 = vadd.f32 %v1748_v42, %v1631_v33  ;;  %v4313_v44 = vpop.f32.mrb[22].mxu0  ;;  %v4821_v42 = vld [vmem:[#allocation9 + $0xc8] sm:$0xff]  }
 0x2cb   : > { %v4333_v45 = vpop.f32.mrb[22].mxu1  ;;  %v1885_v46 = vadd.f32 %v4332_v40, %v1764_v41  ;;  %v1751_v47 = vpop.f32.mrb[23].mxu0  ;;  %v4822_v44 = vld [vmem:[#allocation9 + $0x90] sm:$0xff]  }
 0x2cc   : > { %v1872_v48 = vpop.f32.mrb[23].mxu1  ;;  %v1883_v49 = vadd.f32 %v1869_v0, %v1762_v43  ;;  %v1763_v50 = vadd.f32 %v1751_v47, %v1634_v38  ;;  %v4823_v45 = vld [vmem:[#allocation9 + $0xd0] sm:$0xff]   ;;  %v4825_v47 = vld [vmem:[#allocation9 + $0xd8] sm:$0xff]  }
 0x2ce   : > { %v1884_v51 = vadd.f32 %v1872_v48, %v1763_v50  ;;  %v4826_v48 = vld [vmem:[#allocation9 + $0xa0] sm:$0xff]   ;;  %v4830_v50 = vld [vmem:[#allocation9 + $0xb0] sm:$0xff]  }
 0x2e8   : > { %v4352_v52 = vpop.f32.mrb[24].mxu0 }
 0x2e9   : > { %v2006_v53 = vadd.f32 %v4352_v52, %v1885_v46  ;;  %v4372_v54 = vpop.f32.mrb[24].mxu1  ;;  %v1990_v55 = vpop.f32.mrb[25].mxu0  ;;  %v4824_v46 = vld [vmem:[#allocation9 + $0x98] sm:$0xff]  }
 0x2ea   : > { %v2004_v56 = vadd.f32 %v1990_v55, %v1883_v49  ;;  %v2111_v57 = vpop.f32.mrb[25].mxu1  ;;  %v4353_v58 = vpop.f32.mrb[26].mxu0  ;;  %v4829_v49 = vld [vmem:[#allocation9 + $0xe8] sm:$0xff]   ;;  %v4832_v52 = vld [vmem:[#allocation9 + $0xb8] sm:$0xff]   ;;  %v4835_v55 = vld [vmem:[#allocation9 + $0x140] sm:$0xff]  }
 0x2eb   : > { %v2127_v59 = vadd.f32 %v4372_v54, %v2006_v53  ;;  %v4373_v60 = vpop.f32.mrb[26].mxu1  ;;  %v1993_v61 = vpop.f32.mrb[27].mxu0  ;;  %v4833_v53 = vld [vmem:[#allocation9 + $0xf8] sm:$0xff]   ;;  %v4834_v54 = vld [vmem:[#allocation9 + $0x100] sm:$0xff]  }
 0x2ec   : > { %v2125_v62 = vadd.f32 %v2111_v57, %v2004_v56  ;;  %v2005_v63 = vadd.f32 %v1993_v61, %v1884_v51  ;;  %v2114_v3 = vpop.f32.mrb[27].mxu1  ;;  %v4831_v51 = vld [vmem:[#allocation9 + $0xf0] sm:$0xff]  }
 0x2ee   : > { %v2126_v4 = vadd.f32 %v2114_v3, %v2005_v63  ;;  %v4837_v63 = vld [vmem:[#allocation9 + $0x148] sm:$0xff]  }
 0x308   : > { %v4392_v5 = vpop.f32.mrb[28].mxu0 }
 0x309   : > { %v2248_v6 = vadd.f32 %v4392_v5, %v2127_v59  ;;  %v4412_v7 = vpop.f32.mrb[28].mxu1  ;;  %v2232_v8 = vpop.f32.mrb[29].mxu0  ;;  %v4839_v5 = vld [vmem:[#allocation9 + $0x150] sm:$0xff]  }
 0x30a   : > { %v2246_v10 = vadd.f32 %v2232_v8, %v2125_v62  ;;  %v2353_v11 = vpop.f32.mrb[29].mxu1  ;;  %v4393_v12 = vpop.f32.mrb[30].mxu0  ;;  %v4836_v62 = vld [vmem:[#allocation9 + $0x108] sm:$0xff]   ;;  %v4842_v8 = vld [vmem:[#allocation9 + $0x120] sm:$0xff]  }
 0x30b   : > { %v2369_v13 = vadd.f32 %v4412_v7, %v2248_v6  ;;  %v4413_v14 = vpop.f32.mrb[30].mxu1  ;;  %v2235_v15 = vpop.f32.mrb[31].mxu0  ;;  %v4840_v6 = vld [vmem:[#allocation9 + $0x118] sm:$0xff]   ;;  %v4846_v12 = vld [vmem:[#allocation9 + $0x130] sm:$0xff]  }
 0x30c   : > { %v2367_v1 = vadd.f32 %v2353_v11, %v2246_v10  ;;  %v2247_v2 = vadd.f32 %v2235_v15, %v2126_v4  ;;  %v2356_v16 = vpop.f32.mrb[31].mxu1  ;;  %v4838_v4 = vld [vmem:[#allocation9 + $0x110] sm:$0xff]   ;;  %v4841_v7 = vld [vmem:[#allocation9 + $0x158] sm:$0xff]   ;;  %v4844_v10 = vld [vmem:[#allocation9 + $0x128] sm:$0xff]  }
 0x30d   : > { %v2379_v17 = vadd.f32 %v3775_v9, %v2369_v13  ;;  %v4845_v11 = vld [vmem:[#allocation9 + $0x168] sm:$0xff]   ;;  %v4847_v13 = vld [vmem:[#allocation9 + $0x170] sm:$0xff]   ;;  %v4848_v14 = vld [vmem:[#allocation9 + $0x138] sm:$0xff]  }
 0x30e   : > { %v2377_v18 = vadd.f32 %v3775_v9, %v2367_v1  ;;  %v2368_v19 = vadd.f32 %v2356_v16, %v2247_v2  ;;  %v4849_v15 = vld [vmem:[#allocation9 + $0x178] sm:$0xff]   ;;  %v2986_v1 = vld [vmem:[#allocation3 + $0x15] sm:$0x3]  ;;  %v4850_v2 = vld [vmem:[#allocation9 + $0x180] sm:$0xff]  }
 0x30f   : > { %v2382_v20 = vmax.f32 %v2379_v17, 0.0  ;;  %v4851_v17 = vld [vmem:[#allocation9 + $0x1c0] sm:$0xff]  }
 0x310   : > { %v2380_v23 = vmax.f32 %v2377_v18, 0.0  ;;  %v2378_v24 = vadd.f32 %v3775_v9, %v2368_v19  ;;  %v4843_v9 = vld [vmem:[#allocation9 + $0x160] sm:$0xff]   ;;  %v2988_v18 = vpack.c.bf16 %v2986_v1, %v2986_v1 }
 0x311   : > { %2385 = vst [vmem:[#allocation3 + $0x14] sm:$0x1] %v2382_v20 }
 0x312   : > { %2383 = vst [vmem:[#allocation3 + $0x4] sm:$0xff] %v2380_v23  ;;  %v2381_v25 = vmax.f32 %v2378_v24, 0.0 }
 0x314   : > { %2384 = vst [vmem:[#allocation3 + $0xc] sm:$0xff] %v2381_v25  ;;  %v5472_v26 = vpack.c.bf16 %v2381_v25, %v2380_v23 }
 0x318   : > { %v2865_v16 = vld [vmem:[#allocation3 + $0x14] sm:$0x3] }
 0x319   : > { %v2407_v27 = vld [vmem:[#allocation3 + $0x1] sm:$0xff]  ;;  %v2867_v23 = vpack.c.bf16 %v2865_v16, %v2865_v16 }
 0x31a   : > { %v2386_v30 = vld [vmem:[#allocation3] sm:$0xff] }
 0x31b   : > { %v2408_v31 = vld [vmem:[#allocation3 + $0x9] sm:$0xff]  ;;  %v2409_v21 = vld [vmem:[#allocation3 + $0x11] sm:$0x3]  ;;  %v2744_v57 = vld [vmem:[#allocation3 + $0x13] sm:$0x3] }
 0x31c   : > { %v2387_v22 = vld [vmem:[#allocation3 + $0x8] sm:$0xff]  ;;  %v2410_v32 = vpack.c.bf16 %v2408_v31, %v2407_v27  ;;  %v2411_v34 = vpack.c.bf16 %v2409_v21, %v2409_v21  ;;  %v2388_v35 = vld [vmem:[#allocation3 + $0x10] sm:$0x3]  ;;  %v2623_v56 = vld [vmem:[#allocation3 + $0x12] sm:$0x3]  ;;  %v2746_v61 = vpack.c.bf16 %v2744_v57, %v2744_v57 }
 0x31d   : > { %v2389_v33 = vpack.c.bf16 %v2387_v22, %v2386_v30  ;;  %v2622_v36 = vld [vmem:[#allocation3 + $0xa] sm:$0xff]  ;;  %v2390_v38 = vpack.c.bf16 %v2388_v35, %v2388_v35  ;;  %v2621_v40 = vld [vmem:[#allocation3 + $0x2] sm:$0xff]  ;;  %v2625_v60 = vpack.c.bf16 %v2623_v56, %v2623_v56 }
 0x31e   : > { %v2743_v37 = vld [vmem:[#allocation3 + $0xb] sm:$0xff]  ;;  %4430 = vmatprep.mubr.bf16.mxu0 %v2410_v32  ;;  %v2742_v41 = vld [vmem:[#allocation3 + $0x3] sm:$0xff]  ;;  %v2624_v0 = vpack.c.bf16 %v2622_v36, %v2621_v40  ;;  %v4856_v32 = vld [vmem:[#allocation9 + $0x198] sm:$0xff]  }
 0x31f   : > { %4450 = vmatprep.mubr.bf16.mxu1 %v2389_v33  ;;  %4431 = vmatmul.mubr.bf16.vlgmr.msra.gmra.mrb[32].mxu0 %v2411_v34  ;;  %v2745_v43 = vpack.c.bf16 %v2743_v37, %v2742_v41  ;;  %v2984_v58 = vld [vmem:[#allocation3 + $0x5] sm:$0xff]  ;;  %v2985_v59 = vld [vmem:[#allocation3 + $0xd] sm:$0xff]  ;;  %v4857_v33 = vld [vmem:[#allocation9 + $0x1d8] sm:$0xff]  }
 0x320   : > { %4451 = vmatmul.mubr.bf16.vlgmr.msra.gmra.mrb[32].mxu1 %v2390_v38  ;;  %4455 = vmatpush3.bf16.msra.mxu0 %v5463_v28  ;;  %v4827_v28 = vld [vmem:[#allocation9 + $0xe0] sm:$0xff]   ;;  %v2987_v3 = vpack.c.bf16 %v2985_v59, %v2984_v58  ;;  %v3106_v20 = vld [vmem:[#allocation3 + $0xe] sm:$0xff]  ;;  %v4864_v40 = vld [vmem:[#allocation9 + $0x1b8] sm:$0xff]  }
 0x321   : > { %4475 = vmatpush3.bf16.msra.mxu1 %v5465_v29  ;;  %4470 = vmatprep.mubr.bf16.mxu0 %v2624_v0  ;;  %v4828_v29 = vld [vmem:[#allocation9 + $0xa8] sm:$0xff]   ;;  %v4854_v22 = vld [vmem:[#allocation9 + $0x190] sm:$0xff]   ;;  %v4858_v34 = vld [vmem:[#allocation9 + $0x1a0] sm:$0xff]  }
 0x322   : > { %4490 = vmatprep.mubr.bf16.mxu1 %v2745_v43  ;;  %4456 = vmatprep.subr.bf16.mxu0 %v4820_v39  ;;  %v3105_v19 = vld [vmem:[#allocation3 + $0x6] sm:$0xff]  ;;  %v3227_v25 = vld [vmem:[#allocation3 + $0xf] sm:$0xff]  ;;  %v4865_v41 = vld [vmem:[#allocation9 + $0x1f8] sm:$0xff]  }
 0x323   : > { %4476 = vmatprep.subr.bf16.mxu1 %v4821_v42  ;;  %v3226_v24 = vld [vmem:[#allocation3 + $0x7] sm:$0xff]  ;;  %v3108_v27 = vpack.c.bf16 %v3106_v20, %v3105_v19  ;;  %v4855_v21 = vld [vmem:[#allocation9 + $0x1d0] sm:$0xff]  }
 0x324   : > { %4457 = vmatpush3.bf16.msra.mxu0 %v4820_v39  ;;  %v4853_v30 = vld [vmem:[#allocation9 + $0x1c8] sm:$0xff]   ;;  %v3229_v31 = vpack.c.bf16 %v3227_v25, %v3226_v24  ;;  %v4859_v35 = vld [vmem:[#allocation9 + $0x1e0] sm:$0xff]   ;;  %v4862_v38 = vld [vmem:[#allocation9 + $0x1b0] sm:$0xff]  }
 0x325   : > { %4477 = vmatpush3.bf16.msra.mxu1 %v4821_v42  ;;  %4458 = vmatprep.subr.bf16.mxu0 %v4822_v44  ;;  %v4860_v36 = vld [vmem:[#allocation9 + $0x1a8] sm:$0xff]   ;;  %v4863_v39 = vld [vmem:[#allocation9 + $0x1f0] sm:$0xff]  }
 0x326   : > { %4478 = vmatprep.subr.bf16.mxu1 %v4823_v45  ;;  %v4861_v37 = vld [vmem:[#allocation9 + $0x1e8] sm:$0xff]   ;;  %v3107_v42 = vld [vmem:[#allocation3 + $0x16] sm:$0x3] }
 0x327   : > { %v3228_v0 = vld [vmem:[#allocation3 + $0x17] sm:$0x3]  ;;  %v3109_v43 = vpack.c.bf16 %v3107_v42, %v3107_v42 }
 0x328   : > { %4459 = vmatpush3.bf16.msra.mxu0 %v4822_v44  ;;  %v3230_v44 = vpack.c.bf16 %v3228_v0, %v3228_v0 }
 0x329   : > { %4479 = vmatpush3.bf16.msra.mxu1 %v4823_v45  ;;  %4460 = vmatprep.subr.bf16.mxu0 %v4824_v46  ;;  %v4875_v45 = vld [vmem:[#allocation3 + $0x18] sm:$0xff] }
 0x32a   : > { %4480 = vmatprep.subr.bf16.mxu1 %v4825_v47 }
 0x32c   : > { %4461 = vmatpush3.bf16.msra.mxu0 %v4824_v46  ;;  %v4866_v46 = vld [vmem:[%s5595_s8] sm:$0xff]  }
 0x32d   : > { %4481 = vmatpush3.bf16.msra.mxu1 %v4825_v47  ;;  %4462 = vmatprep.subr.bf16.mxu0 %v4826_v48  ;;  %v4867_v47 = vld [vmem:[%s5595_s8 + $0x8] sm:$0xff]  }
 0x32e   : > { %4482 = vmatprep.subr.bf16.mxu1 %v4827_v28 }
 0x330   : > { %4463 = vmatpush3.bf16.msra.mxu0 %v4826_v48  ;;  %v4868_v48 = vld [vmem:[%s5595_s8 + $0x10] sm:$0xff]  }
 0x331   : > { %4483 = vmatpush3.bf16.msra.mxu1 %v4827_v28  ;;  %4464 = vmatprep.subr.bf16.mxu0 %v4828_v29  ;;  %v4869_v28 = vld [vmem:[%s5595_s8 + $0x18] sm:$0xff]  }
 0x332   : > { %4484 = vmatprep.subr.bf16.mxu1 %v4829_v49 }
 0x334   : > { %4465 = vmatpush3.bf16.msra.mxu0 %v4828_v29  ;;  %v4870_v29 = vld [vmem:[%s5595_s8 + $0x20] sm:$0xff]  }
 0x335   : > { %4485 = vmatpush3.bf16.msra.mxu1 %v4829_v49  ;;  %4466 = vmatprep.subr.bf16.mxu0 %v4830_v50  ;;  %v4871_v49 = vld [vmem:[%s5595_s8 + $0x28] sm:$0xff]  }
 0x336   : > { %4486 = vmatprep.subr.bf16.mxu1 %v4831_v51 }
 0x338   : > { %4467 = vmatpush3.bf16.msra.mxu0 %v4830_v50  ;;  %v4872_v50 = vld [vmem:[%s5595_s8 + $0x30] sm:$0xff]  }
 0x339   : > { %4487 = vmatpush3.bf16.msra.mxu1 %v4831_v51  ;;  %4468 = vmatprep.subr.bf16.mxu0 %v4832_v52  ;;  %v4873_v51 = vld [vmem:[%s5595_s8 + $0x38] sm:$0xff]  }
 0x33a   : > { %4488 = vmatprep.subr.bf16.mxu1 %v4833_v53 }
 0x33c   : > { %4469 = vmatpush3.bf16.msra.mxu0 %v4832_v52 }
 0x33d   : > { %4489 = vmatpush3.bf16.msra.mxu1 %v4833_v53  ;;  %4494 = vmatprep.subr.bf16.mxu0 %v4834_v54 }
 0x33e   : > { %4514 = vmatprep.subr.bf16.mxu1 %v4835_v55 }
 0x33f   : > { %4471 = vmatmul.mubr.bf16.vlgmr.msra.gmra.mrb[36].mxu0 %v2625_v60 }
 0x340   : > { %4491 = vmatmul.mubr.bf16.vlgmr.msra.gmra.mrb[36].mxu1 %v2746_v61  ;;  %4495 = vmatpush3.bf16.msra.mxu0 %v4834_v54 }
 0x341   : > { %4510 = vmatprep.mubr.bf16.mxu0 %v5472_v26  ;;  %4515 = vmatpush3.bf16.msra.mxu1 %v4835_v55  ;;  %v4852_v26 = vld [vmem:[#allocation9 + $0x188] sm:$0xff]  }
 0x342   : > { %4530 = vmatprep.mubr.bf16.mxu1 %v2987_v3  ;;  %4496 = vmatprep.subr.bf16.mxu0 %v4836_v62 }
 0x343   : > { %4516 = vmatprep.subr.bf16.mxu1 %v4837_v63 }
 0x344   : > { %4497 = vmatpush3.bf16.msra.mxu0 %v4836_v62 }
 0x345   : > { %4517 = vmatpush3.bf16.msra.mxu1 %v4837_v63  ;;  %4498 = vmatprep.subr.bf16.mxu0 %v4838_v4 }
 0x346   : > { %4518 = vmatprep.subr.bf16.mxu1 %v4839_v5 }
 0x348   : > { %4499 = vmatpush3.bf16.msra.mxu0 %v4838_v4 }
 0x349   : > { %4519 = vmatpush3.bf16.msra.mxu1 %v4839_v5  ;;  %4500 = vmatprep.subr.bf16.mxu0 %v4840_v6 }
 0x34a   : > { %4520 = vmatprep.subr.bf16.mxu1 %v4841_v7 }
 0x34c   : > { %4501 = vmatpush3.bf16.msra.mxu0 %v4840_v6 }
 0x34d   : > { %4521 = vmatpush3.bf16.msra.mxu1 %v4841_v7  ;;  %4502 = vmatprep.subr.bf16.mxu0 %v4842_v8 }
 0x34e   : > { %4522 = vmatprep.subr.bf16.mxu1 %v4843_v9 }
 0x350   : > { %4503 = vmatpush3.bf16.msra.mxu0 %v4842_v8 }
 0x351   : > { %4523 = vmatpush3.bf16.msra.mxu1 %v4843_v9  ;;  %4504 = vmatprep.subr.bf16.mxu0 %v4844_v10 }
 0x352   : > { %4524 = vmatprep.subr.bf16.mxu1 %v4845_v11 }
 0x354   : > { %4505 = vmatpush3.bf16.msra.mxu0 %v4844_v10 }
 0x355   : > { %4525 = vmatpush3.bf16.msra.mxu1 %v4845_v11  ;;  %4506 = vmatprep.subr.bf16.mxu0 %v4846_v12 }
 0x356   : > { %4526 = vmatprep.subr.bf16.mxu1 %v4847_v13 }
 0x358   : > { %4507 = vmatpush3.bf16.msra.mxu0 %v4846_v12 }
 0x359   : > { %4527 = vmatpush3.bf16.msra.mxu1 %v4847_v13  ;;  %4508 = vmatprep.subr.bf16.mxu0 %v4848_v14 }
 0x35a   : > { %4528 = vmatprep.subr.bf16.mxu1 %v4849_v15 }
 0x35c   : > { %4509 = vmatpush3.bf16.msra.mxu0 %v4848_v14 }
 0x35d   : > { %4529 = vmatpush3.bf16.msra.mxu1 %v4849_v15  ;;  %4534 = vmatprep.subr.bf16.mxu0 %v4850_v2 }
 0x35e   : > { %4554 = vmatprep.subr.bf16.mxu1 %v4851_v17 }
 0x35f   : > { %4511 = vmatmul.mubr.bf16.vlgmr.msra.gmra.mrb[40].mxu0 %v2867_v23 }
 0x360   : > { %4531 = vmatmul.mubr.bf16.vlgmr.msra.gmra.mrb[40].mxu1 %v2988_v18  ;;  %4535 = vmatpush3.bf16.msra.mxu0 %v4850_v2 }
 0x361   : > { %4550 = vmatprep.mubr.bf16.mxu0 %v3108_v27  ;;  %4555 = vmatpush3.bf16.msra.mxu1 %v4851_v17 }
 0x362   : > { %4570 = vmatprep.mubr.bf16.mxu1 %v3229_v31  ;;  %4536 = vmatprep.subr.bf16.mxu0 %v4852_v26 }
 0x363   : > { %4556 = vmatprep.subr.bf16.mxu1 %v4853_v30 }
 0x364   : > { %4537 = vmatpush3.bf16.msra.mxu0 %v4852_v26 }
 0x365   : > { %4557 = vmatpush3.bf16.msra.mxu1 %v4853_v30  ;;  %4538 = vmatprep.subr.bf16.mxu0 %v4854_v22 }
 0x366   : > { %4558 = vmatprep.subr.bf16.mxu1 %v4855_v21 }
 0x368   : > { %4539 = vmatpush3.bf16.msra.mxu0 %v4854_v22 }
 0x369   : > { %4559 = vmatpush3.bf16.msra.mxu1 %v4855_v21  ;;  %4540 = vmatprep.subr.bf16.mxu0 %v4856_v32 }
 0x36a   : > { %4560 = vmatprep.subr.bf16.mxu1 %v4857_v33 }
 0x36c   : > { %4541 = vmatpush3.bf16.msra.mxu0 %v4856_v32 }
 0x36d   : > { %4561 = vmatpush3.bf16.msra.mxu1 %v4857_v33  ;;  %4542 = vmatprep.subr.bf16.mxu0 %v4858_v34 }
 0x36e   : > { %4562 = vmatprep.subr.bf16.mxu1 %v4859_v35 }
 0x370   : > { %4543 = vmatpush3.bf16.msra.mxu0 %v4858_v34  ;;  %v3840_v34 = vld [vmem:[%s5594_s7] ss:$0 sm:$0xff] }
 0x371   : > { %4563 = vmatpush3.bf16.msra.mxu1 %v4859_v35  ;;  %4544 = vmatprep.subr.bf16.mxu0 %v4860_v36 }
 0x372   : > { %4564 = vmatprep.subr.bf16.mxu1 %v4861_v37 }
 0x374   : > { %4545 = vmatpush3.bf16.msra.mxu0 %v4860_v36 }
 0x375   : > { %4565 = vmatpush3.bf16.msra.mxu1 %v4861_v37  ;;  %4546 = vmatprep.subr.bf16.mxu0 %v4862_v38 }
 0x376   : > { %4566 = vmatprep.subr.bf16.mxu1 %v4863_v39 }
 0x378   : > { %4547 = vmatpush3.bf16.msra.mxu0 %v4862_v38 }
 0x379   : > { %4567 = vmatpush3.bf16.msra.mxu1 %v4863_v39  ;;  %4548 = vmatprep.subr.bf16.mxu0 %v4864_v40 }
 0x37a   : > { %4568 = vmatprep.subr.bf16.mxu1 %v4865_v41 }
 0x37c   : > { %4549 = vmatpush3.bf16.msra.mxu0 %v4864_v40 }
 0x37d   : > { %4569 = vmatpush3.bf16.msra.mxu1 %v4865_v41  ;;  %4574 = vmatprep.subr.bf16.mxu0 %v4875_v45 }
 0x37f   : > { %4551 = vmatmul.mubr.bf16.vlgmr.msra.gmra.mrb[44].mxu0 %v3109_v43 }
 0x380   : > { %4571 = vmatmul.mubr.bf16.vlgmr.msra.gmra.mrb[44].mxu1 %v3230_v44  ;;  %4590 = vmatprep.mubr.msk.bf16.mxu0 %vm5070_vm0, %v4875_v45 }
 0x381   : > { %4575 = vmatpush3.bf16.msra.mxu0 %v4866_v46 }
 0x382   : > { %4576 = vmatprep.subr.bf16.mxu0 %v4875_v45 }
 0x385   : > { %4577 = vmatpush3.bf16.msra.mxu0 %v4867_v47 }
 0x386   : > { %4578 = vmatprep.subr.bf16.mxu0 %v4875_v45 }
 0x389   : > { %4579 = vmatpush3.bf16.msra.mxu0 %v4868_v48 }
 0x38a   : > { %4580 = vmatprep.subr.bf16.mxu0 %v4875_v45 }
 0x38d   : > { %4581 = vmatpush3.bf16.msra.mxu0 %v4869_v28 }
 0x38e   : > { %4582 = vmatprep.subr.bf16.mxu0 %v4875_v45 }
 0x391   : > { %4583 = vmatpush3.bf16.msra.mxu0 %v4870_v29 }
 0x392   : > { %4584 = vmatprep.subr.bf16.mxu0 %v4875_v45 }
 0x395   : > { %4585 = vmatpush3.bf16.msra.mxu0 %v4871_v49 }
 0x396   : > { %4586 = vmatprep.subr.bf16.mxu0 %v4875_v45 }
 0x399   : > { %4587 = vmatpush3.bf16.msra.mxu0 %v4872_v50 }
 0x39a   : > { %4588 = vmatprep.subr.bf16.mxu0 %v4875_v45 }
 0x39d   : > { %4589 = vmatpush3.bf16.msra.mxu0 %v4873_v51 }
 0x3f2   : > { %v4432_v52 = vpop.f32.mrb[32].mxu0 }
 0x3f3   : > { %v4452_v53 = vpop.f32.mrb[32].mxu1  ;;  %v2511_v55 = vpop.f32.mrb[33].mxu0 }
 0x3f4   : > { %v2616_v54 = vadd.f32 %v4452_v53, %v4432_v52  ;;  %v2607_v56 = vpop.f32.mrb[33].mxu1  ;;  %v4433_v58 = vpop.f32.mrb[34].mxu0 }
 0x3f5   : > { %v2608_v57 = vadd.f32 %v2607_v56, %v2511_v55  ;;  %v4453_v59 = vpop.f32.mrb[34].mxu1  ;;  %v2514_v60 = vpop.f32.mrb[35].mxu0 }
 0x3f6   : > { %v2610_v61 = vpop.f32.mrb[35].mxu1 }
 0x3f7   : > { %v2611_v62 = vadd.f32 %v2610_v61, %v2514_v60 }
 0x412   : > { %v4472_v63 = vpop.f32.mrb[36].mxu0 }
 0x413   : > { %v4492_v3 = vpop.f32.mrb[36].mxu1  ;;  %v2741_v4 = vadd.f32 %v4472_v63, %v2616_v54  ;;  %v2725_v5 = vpop.f32.mrb[37].mxu0 }
 0x414   : > { %v2846_v6 = vpop.f32.mrb[37].mxu1  ;;  %v2739_v7 = vadd.f32 %v2725_v5, %v2608_v57  ;;  %v4473_v8 = vpop.f32.mrb[38].mxu0 }
 0x415   : > { %v4493_v9 = vpop.f32.mrb[38].mxu1  ;;  %v2862_v10 = vadd.f32 %v4492_v3, %v2741_v4  ;;  %v2728_v11 = vpop.f32.mrb[39].mxu0 }
 0x416   : > { %v2849_v12 = vpop.f32.mrb[39].mxu1  ;;  %v2860_v13 = vadd.f32 %v2846_v6, %v2739_v7  ;;  %v2740_v14 = vadd.f32 %v2728_v11, %v2611_v62 }
 0x418   : > { %v2861_v15 = vadd.f32 %v2849_v12, %v2740_v14 }
 0x432   : > { %v4512_v1 = vpop.f32.mrb[40].mxu0 }
 0x433   : > { %v2983_v2 = vadd.f32 %v4512_v1, %v2862_v10  ;;  %v4532_v16 = vpop.f32.mrb[40].mxu1  ;;  %v2967_v17 = vpop.f32.mrb[41].mxu0 }
 0x434   : > { %v2981_v18 = vadd.f32 %v2967_v17, %v2860_v13  ;;  %v3088_v19 = vpop.f32.mrb[41].mxu1  ;;  %v4513_v20 = vpop.f32.mrb[42].mxu0 }
 0x435   : > { %v3104_v23 = vadd.f32 %v4532_v16, %v2983_v2  ;;  %v4533_v24 = vpop.f32.mrb[42].mxu1  ;;  %v2970_v25 = vpop.f32.mrb[43].mxu0 }
 0x436   : > { %v3102_v26 = vadd.f32 %v3088_v19, %v2981_v18  ;;  %v2982_v27 = vadd.f32 %v2970_v25, %v2861_v15  ;;  %v3091_v30 = vpop.f32.mrb[43].mxu1 }
 0x438   : > { %v3103_v31 = vadd.f32 %v3091_v30, %v2982_v27 }
 0x452   : > { %v4552_v22 = vpop.f32.mrb[44].mxu0 }
 0x453   : > { %v3225_v21 = vadd.f32 %v4552_v22, %v3104_v23  ;;  %v4572_v32 = vpop.f32.mrb[44].mxu1  ;;  %v3209_v33 = vpop.f32.mrb[45].mxu0 }
 0x454   : > { %v3223_v35 = vadd.f32 %v3209_v33, %v3102_v26  ;;  %v3330_v36 = vpop.f32.mrb[45].mxu1  ;;  %v4553_v37 = vpop.f32.mrb[46].mxu0 }
 0x455   : > { %v3346_v38 = vadd.f32 %v4572_v32, %v3225_v21  ;;  %v4573_v39 = vpop.f32.mrb[46].mxu1  ;;  %v3212_v40 = vpop.f32.mrb[47].mxu0 }
 0x456   : > { %v3344_v41 = vadd.f32 %v3330_v36, %v3223_v35  ;;  %v3224_v42 = vadd.f32 %v3212_v40, %v3103_v31  ;;  %v3333_v0 = vpop.f32.mrb[47].mxu1 }
 0x457   : > { %v3356_v43 = vadd.f32 %v3840_v34, %v3346_v38 }
 0x458   : > { %v3354_v44 = vadd.f32 %v3840_v34, %v3344_v41  ;;  %v3345_v45 = vadd.f32 %v3333_v0, %v3224_v42 }
 0x459   : > { %v3359_v47 = vmax.f32 %v3356_v43, 0.0 }
 0x45a   : > { %v3355_v46 = vadd.f32 %v3840_v34, %v3345_v45  ;;  %v3357_v48 = vmax.f32 %v3354_v44, 0.0 }
 0x45b   : > { %v3361_v49 = vsel %vm3360_vm4, %v3359_v47, -inf }
 0x45c   : > { %v3358_v28 = vmax.f32 %v3355_v46, 0.0 }
 0x45e   : > { %v3362_v29 = vmax.f32 %v3357_v48, %v3358_v28 }
 0x460   : > { %v3363_v50 = vmax.f32 %v3362_v29, %v3361_v49 }
 0x462   : > { %v3364_v51 = vrot.slane %v3363_v50, 4 }
 0x464   : > { %v3365_v52 = vmax.f32 %v3363_v50, %v3364_v51 }
 0x466   : > { %v3366_v53 = vrot.slane %v3365_v52, 2 }
 0x468   : > { %v3367_v54 = vmax.f32 %v3365_v52, %v3366_v53 }
 0x46a   : > { %v3368_v55 = vrot.slane %v3367_v54, 1 }
 0x46c   : > { %v3369_v56 = vmax.f32 %v3367_v54, %v3368_v55 }
 0x46e   : > { %v3371_v57 = vpack.c.bf16 %v3369_v56, %v3369_v56  ;;  %3370 = vst [vmem:[%s447_s12] sm:$0x1] %v3369_v56 }
 0x470   : > { %4591 = vmatmul.mubr.bf16.vlgmr.msra.gmra.mrb[48].mxu0 %v3371_v57 }
 0x471   : > { %4973 = shalt.err (!%p4970_p9)
}
 0x472   : > { %s4974_s28 = scalar_lea.hbm %s5515_s29, 16  ;;  %s4978_s14 = scalar_lea.hbm %s5598_s11, 32 }
 0x473   : > { %p4975_p2 = scmp.ne.s32.totalorder %s5515_s29, %s4974_s28  ;;  %p4979_p5 = scmp.lt.u32.totalorder %s5515_s29, %s5598_s11 }
 0x474   : > { %p4980_p10 = scmp.lt.u32.totalorder %s4978_s14, %s4974_s28  ;;  %p4982_p4 = scmp.lt.u32.totalorder %s4974_s28, %s5515_s29 }
 0x475   : > { %p4976_p0 = pnand %p4975_p2, %p5626_p7 }
 0x476   : > { %p4981_p12 = por %p4980_p10, %p4979_p5 }
 0x477   : > { %p4977_p3 = pneg %p4976_p0 }
 0x478   : > { %p4983_p8 = por %p4982_p4, %p4981_p12 }
 0x47a   : > { %p4984_p11 = pnand %p4983_p8, %p4977_p3 }
 0x47c   : > { %4987 = shalt.err (!%p4984_p11)
}
 0x47d   : > { %4608 = dma.vmem_to_hbm [thread:$0]  (%p5626_p7), %s3509_s13, 16, %s5515_s29, %s3483_s22   ;;  %v3388_v58 = vld [vmem:[%s5596_s9] sm:$0x1] }
 0x47e   : > { %s441_s24 = scalar_lea.vmem [#allocation10], %s5506_s19  ;;  %s5627_s28 = sld [smem:[#allocation23_spill]] }
 0x47f   : > { %s3495_s26 = sshll.u32 %s441_s24, 4  ;;  %s3479_s29 = scalar_lea.sflag [#allocation6], %s5506_s19  ;;  %s5546_s26 = int_to_ptr.vmem [resolvable:$true] %s3495_s26 }
 0x480   : > { %s4988_s13 = scalar_lea.vmem %s5546_s26, 16  ;;  %s5072_s21 = smov [#allocation10]  }
 0x481   : > { %p4989_p13 = scmp.ne.s32.totalorder %s5546_s26, %s4988_s13  ;;  %s4992_s22 = sshll.u32 %s5072_s21, 4  ;;  %s4993_s22 = int_to_ptr.vmem [resolvable:$false] %s4992_s22 }
 0x482   : > { %s4994_s30 = scalar_lea.vmem %s4993_s22, 32  ;;  %p4995_p9 = scmp.lt.s32.totalorder %s5546_s26, %s4993_s22 }
 0x483   : > { %p4990_p1 = pnand %p4989_p13, %p5626_p7  ;;  %p4996_p2 = scmp.lt.s32.totalorder %s4994_s30, %s4988_s13 }
 0x484   : > { %s5544_s25 = scalar_lea.hbm %s5627_s28, %s3849_s15 }
 0x485   : > { %p4991_p6 = pneg %p4990_p1  ;;  %p4997_p0 = por %p4996_p2, %p4995_p9 }
 0x487   : > { %p4998_p3 = pnand %p4997_p0, %p4991_p6 }
 0x543   : > { %v3471_v59 = vpop.f32.mrb[48].mxu0 }
 0x544   : > { %v3472_v60 = vadd.f32 %v3471_v59, %v3388_v58  ;;  %v4592_v61 = vpop.f32.mrb[49].mxu0 }
 0x545   : > { %v3474_v62 = vpop.f32.mrb[50].mxu0 }
 0x546   : > { %3477 = vst [vmem:[%s441_s24] sm:$0x1] %v3472_v60  ;;  %v4593_v63 = vpop.f32.mrb[51].mxu0 }
 0x547   : > { %5001 = shalt.err (!%p4998_p3)
}
 0x548   : > { %s5002_s19 = scalar_lea.hbm %s5544_s25, 16  ;;  %s5006_s16 = scalar_lea.hbm %s5627_s28, 32 }
 0x549   : > { %p5003_p5 = scmp.ne.s32.totalorder %s5544_s25, %s5002_s19  ;;  %p5007_p4 = scmp.lt.u32.totalorder %s5544_s25, %s5627_s28 }
 0x54a   : > { %p5008_p8 = scmp.lt.u32.totalorder %s5006_s16, %s5002_s19  ;;  %p5010_p13 = scmp.lt.u32.totalorder %s5002_s19, %s5544_s25 }
 0x54b   : > { %p5004_p10 = pnand %p5003_p5, %p5626_p7 }
 0x54c   : > { %p5009_p11 = por %p5008_p8, %p5007_p4 }
 0x54d   : > { %p5005_p12 = pneg %p5004_p10 }
 0x54e   : > { %p5011_p1 = por %p5010_p13, %p5009_p11 }
 0x550   : > { %p5012_p6 = pnand %p5011_p1, %p5005_p12 }
 0x552   : > { %5015 = shalt.err (!%p5012_p6)
}
 0x553   : > { %4607 = dma.vmem_to_hbm [thread:$0]  (%p5626_p7), %s5546_s26, 16, %s5544_s25, %s3479_s29  }
 0x554 PF: > { %s5628_s23 = sld [smem:[#allocation19_spill]]  ;;  %s5629_s24 = sld [smem:[#allocation17_spill]] }
 0x555   : > { %s5630_s17 = sld [smem:[#allocation22_spill]] }
 0x55a   : > { %p4634_p9 = scmp.ge.s32.totalorder %s5628_s23, 2  ;;  %s3520_s20 = sand.u32 1, %s5629_s24  }
 0x55b   : > { %p5631_p2 = scmp.ne.s32.totalorder %s5630_s17, 0  ;;  %s3521_s13 = scalar_lea.sflag [#allocation6], %s3520_s20 }
 0x55d   : > { %p4622_p0 = pnand %p4634_p9, %p5631_p2 }
 0x55f   : > { %5041 = dma.done.wait (!%p4622_p0), %s3521_s13, 16  }
 0x560   : > { %5043 = vsyncadd (!%p4622_p0), %s3521_s13, 4294967280  ;;  %s3529_s21 = scalar_lea.sflag [#allocation12], %s3520_s20 }
 0x561   : > { %5045 = dma.done.wait (!%p4622_p0), %s3529_s21, 16  }
 0x562   : > { %5047 = vsyncadd (!%p4622_p0), %s3529_s21, 4294967280  ;;  %s5632_s20 = sld [smem:[#allocation20_spill]]  ;;  %s5633_s27 = sld [smem:[#allocation18_spill]] }
 0x563   : > { %s5634_s19 = sld [smem:[#allocation21_spill]]  ;;  %s5635_s17 = smov %s5054_s18 }
 0x568   : > { %p27_p7 = scmp.ge.s32.totalorder %s5632_s20, 4   ;;  %s5636_s18 = smov %s5633_s27 }
 0x56a   :  { %29 = sbr.rel (!%p27_p7) target bundleno = 9 (0x9), region = 149 }
 0x571   :  { %3533 = vsyncpa [#allocation5], 1 }
 0x572   :  { %3535 = vsyncpa [#allocation5 + $0x1], 1 }
 0x573   :  { %3536 = vsyncpa [#allocation8], 1 }
 0x574   :  { %3537 = vsyncpa [#allocation6], 1 }
 0x575   :  { %3539 = vsyncpa [#allocation6 + $0x1], 1 }
 0x576   :  { %3540 = vsyncpa [#allocation12], 1 }
 0x577   :  { %3542 = vsyncpa [#allocation12 + $0x1], 1 }

</bundles_post_ra>
